<compile_context>
chip_gen: v7x
topology: tpu7x:2x2x1
jax: 0.10.0
libtpu: 0.0.40
codegen_flags: <defaults>
</compile_context>

<pallas_src>
import math

import jax
import jax.numpy as jnp
from jax.experimental import pallas as pl
from jax.experimental.pallas import tpu as pltpu

# ----------------- small synthetic configuration -----------------
B = 2
IN_CHANS = 3
IMAGE_SIZE = (16, 16)
PATCH_SIZE = (8, 8)
DECODE_DEPTH = 2                       # -> k = 4, decode_scale = (2, 2)
HIDDEN_DIM = 32                        # == backbone embed_dim
NUM_HEADS = 4
HEAD_DIM = HIDDEN_DIM // NUM_HEADS
MLP_DIM = 4 * HIDDEN_DIM
DEPTH = 2                              # real vit_base has 12 blocks; small here
LN_EPS = 1e-6

NUM_PS = (IMAGE_SIZE[0] // PATCH_SIZE[0], IMAGE_SIZE[1] // PATCH_SIZE[1])
_K = int(math.pow(2, DECODE_DEPTH))
assert PATCH_SIZE[0] % _K == 0 and PATCH_SIZE[1] % _K == 0
DECODE_SCALE = (PATCH_SIZE[0] // _K, PATCH_SIZE[1] // _K)

N_PATCH = NUM_PS[0] * NUM_PS[1]                                 # 4 patches / image
N_TOK = N_PATCH + 1                                             # + cls token
PATCH_IN = IN_CHANS * PATCH_SIZE[0] * PATCH_SIZE[1]             # 192
DEC_W = HIDDEN_DIM * DECODE_SCALE[0] * DECODE_SCALE[1]          # 128 (lane-dense)
ATTN_SCALE = HEAD_DIM ** -0.5
ROWS = B * N_TOK                                                # 10 token rows total
OUT_ROWS = B * N_PATCH                                          # 8 output rows total


# ----------------- fused Pallas kernel (whole batch in one invocation) -----------------
def _encoder_kernel(
    patches_ref,                    # (ROWS, PATCH_IN) bf16; zero row at each cls position
    base_ref,                       # (ROWS, D) f32: [cls+pos0 ; pos1..4 + patch_b] per batch
    attn_bias_ref,                  # (ROWS, ROWS) f32: block-diagonal 0 / -1e30
    patch_w_ref,                    # (PATCH_IN, D) bf16
    qkv_w_ref, qkv_b_ref,           # (DEPTH, D, 3D) bf16, (DEPTH, 1, 3D) f32  (ln1 folded)
    proj_w_ref, proj_b_ref,         # (DEPTH, D, D) bf16, (DEPTH, 1, D) f32
    fc1_w_ref, fc1_b_ref,           # (DEPTH, D, MLP) bf16, (DEPTH, 1, MLP) f32 (ln2 folded)
    fc2_w_ref, fc2_b_ref,           # (DEPTH, MLP, D) bf16, (DEPTH, 1, D) f32
    norm_g_ref, norm_b_ref,         # (1, D) f32  (final norm kept un-folded)
    fc_w_ref, fc_b_ref,             # (D, DEC_W) bf16, (1, DEC_W) f32
    enc_ref,                        # out: (OUT_ROWS, D) f32
    dec_ref,                        # out: (OUT_ROWS, DEC_W) f32
):
    D = HIDDEN_DIM

    def ln_core(t):
        # normalization only; gamma/beta of ln1/ln2 are folded into the next matmul
        mu = jnp.mean(t, axis=-1, keepdims=True)
        tc = t - mu
        var = jnp.mean(tc * tc, axis=-1, keepdims=True)
        return tc * jax.lax.rsqrt(var + LN_EPS)

    attn_bias = attn_bias_ref[...]

    # ---- patch embed (+cls token +pos embed, all folded into `base`) : one matmul ----
    x = jnp.dot(patches_ref[...], patch_w_ref[...],
                preferred_element_type=jnp.float32) + base_ref[...]      # (ROWS, D) f32

    # ---- transformer blocks: statically unrolled, activations stay in vregs ----
    for d in range(DEPTH):
        # attention
        y = ln_core(x).astype(jnp.bfloat16)
        qkv = jnp.dot(y, qkv_w_ref[d],
                      preferred_element_type=jnp.float32) + qkv_b_ref[d]  # (ROWS, 3D) f32
        heads = []
        for hh in range(NUM_HEADS):
            lo = hh * HEAD_DIM
            qh = qkv[:, lo:lo + HEAD_DIM]
            kh = qkv[:, D + lo:D + lo + HEAD_DIM]
            vh = qkv[:, 2 * D + lo:2 * D + lo + HEAD_DIM]
            s = jax.lax.dot_general(qh, kh, (((1,), (1,)), ((), ())),
                                    preferred_element_type=jnp.float32)
            s = s * ATTN_SCALE + attn_bias            # block-diagonal batch mask
            s = s - jnp.max(s, axis=-1, keepdims=True)
            p = jnp.exp(s)
            p = p / jnp.sum(p, axis=-1, keepdims=True)  # exact softmax
            heads.append(jnp.dot(p, vh, preferred_element_type=jnp.float32))
        attn = jnp.concatenate(heads, axis=-1)         # (ROWS, D), stays in registers
        o = jnp.dot(attn.astype(jnp.bfloat16), proj_w_ref[d],
                    preferred_element_type=jnp.float32) + proj_b_ref[d]
        x = x + o                                      # residual (f32)

        # MLP
        y = ln_core(x).astype(jnp.bfloat16)
        h1 = jnp.dot(y, fc1_w_ref[d],
                     preferred_element_type=jnp.float32) + fc1_b_ref[d]
        h1 = jax.nn.gelu(h1, approximate=True)         # tanh GELU -> EUP slot
        h2 = jnp.dot(h1.astype(jnp.bfloat16), fc2_w_ref[d],
                     preferred_element_type=jnp.float32) + fc2_b_ref[d]
        x = x + h2                                     # residual (f32)

    # ---- final norm, drop cls tokens, decode FC (lane-dense 128-wide store) ----
    feats = ln_core(x) * norm_g_ref[...] + norm_b_ref[...]
    enc = jnp.concatenate(
        [feats[b * N_TOK + 1:(b + 1) * N_TOK, :] for b in range(B)], axis=0)  # (OUT_ROWS, D)
    enc_ref[...] = enc.astype(enc_ref.dtype)
    dec = jnp.dot(enc.astype(jnp.bfloat16), fc_w_ref[...],
                  preferred_element_type=jnp.float32) + fc_b_ref[...]
    dec_ref[...] = dec.astype(dec_ref.dtype)


def _full_spec(shape):
    """Whole-array block (single grid step)."""
    n = len(shape)
    return pl.BlockSpec(shape, lambda i: (0,) * n)


# ----------------- parameters (deterministic synthetic init) -----------------
def init_params(key):
    keys = iter(jax.random.split(key, 64))

    def nrm(shape, std=0.02):
        return std * jax.random.normal(next(keys), shape, jnp.float32)

    D = HIDDEN_DIM
    return {
        # FlexiPatchEmbed proj: conv(kernel=stride=patch) flattened as matmul
        "patch_w": nrm((PATCH_IN, D)),
        "patch_b": nrm((1, D)),
        "cls": nrm((1, D)),
        "pos": nrm((N_TOK, D)),
        "norm_g": jnp.ones((1, D), jnp.float32),
        "norm_b": jnp.zeros((1, D), jnp.float32),
        # Encoder2D.fc : hidden_dim -> hidden_dim * p1 * p2
        "fc_w": nrm((D, DEC_W)),
        "fc_b": nrm((1, DEC_W)),
        # per-block params stacked along a leading DEPTH axis
        "ln1_g": jnp.ones((DEPTH, 1, D), jnp.float32),
        "ln1_b": jnp.zeros((DEPTH, 1, D), jnp.float32),
        "qkv_w": nrm((DEPTH, D, 3 * D)),
        "qkv_b": nrm((DEPTH, 1, 3 * D)),
        "proj_w": nrm((DEPTH, D, D)),
        "proj_b": nrm((DEPTH, 1, D)),
        "ln2_g": jnp.ones((DEPTH, 1, D), jnp.float32),
        "ln2_b": jnp.zeros((DEPTH, 1, D), jnp.float32),
        "fc1_w": nrm((DEPTH, D, MLP_DIM)),
        "fc1_b": nrm((DEPTH, 1, MLP_DIM)),
        "fc2_w": nrm((DEPTH, MLP_DIM, D)),
        "fc2_b": nrm((DEPTH, 1, D)),
    }


def prepare_params(p):
    """Init-time weight transforms (perf review):
       * fold ln1/ln2 gamma into the qkv / fc1 weight columns and beta into their biases,
       * cast weight matrices to bf16 (matmul accumulation stays f32 in-kernel)."""
    qkv_w = p["qkv_w"] * jnp.transpose(p["ln1_g"], (0, 2, 1))
    qkv_b = p["qkv_b"] + jnp.einsum("dij,djk->dik", p["ln1_b"], p["qkv_w"])
    fc1_w = p["fc1_w"] * jnp.transpose(p["ln2_g"], (0, 2, 1))
    fc1_b = p["fc1_b"] + jnp.einsum("dij,djk->dik", p["ln2_b"], p["fc1_w"])
    bf = jnp.bfloat16
    return {
        "patch_w": p["patch_w"].astype(bf),
        "patch_b": p["patch_b"],
        "cls": p["cls"],
        "pos": p["pos"],
        "norm_g": p["norm_g"],
        "norm_b": p["norm_b"],
        "fc_w": p["fc_w"].astype(bf),
        "fc_b": p["fc_b"],
        "qkv_w": qkv_w.astype(bf),
        "qkv_b": qkv_b,
        "proj_w": p["proj_w"].astype(bf),
        "proj_b": p["proj_b"],
        "fc1_w": fc1_w.astype(bf),
        "fc1_b": fc1_b,
        "fc2_w": p["fc2_w"].astype(bf),
        "fc2_b": p["fc2_b"],
    }


# ----------------- forward pass (Encoder2D.forward semantics) -----------------
def encoder2d_forward(params, x):
    # layout: x is NCHW [B, C_in, H, W]
    Bn, C, H, W = x.shape
    ph, pw = PATCH_SIZE
    assert H % ph == 0 and W % pw == 0
    h, w = H // ph, W // pw
    rows = Bn * N_TOK

    # per-patch flatten + a zero "cls patch" row per batch (pure layout glue, KB-sized)
    patches = (
        x.reshape(Bn, C, h, ph, w, pw)
         .transpose(0, 2, 4, 1, 3, 5)              # (B, h, w, C, ph, pw)
         .reshape(Bn, N_PATCH, PATCH_IN)
    )
    patches_tok = jnp.concatenate(
        [jnp.zeros((Bn, 1, PATCH_IN), patches.dtype), patches], axis=1,
    ).reshape(rows, PATCH_IN).astype(jnp.bfloat16)

    # additive token base: cls row -> cls + pos[0];  patch rows -> pos[1:] + patch_b
    base = jnp.tile(
        jnp.concatenate([params["cls"] + params["pos"][0:1],
                         params["pos"][1:] + params["patch_b"]], axis=0),
        (Bn, 1)).astype(jnp.float32)                                    # (rows, D)

    # block-diagonal attention bias: same-batch tokens attend, cross-batch masked out
    tok_batch = jnp.repeat(jnp.arange(Bn), N_TOK)
    attn_bias = jnp.where(tok_batch[:, None] == tok_batch[None, :],
                          0.0, -1e30).astype(jnp.float32)               # (rows, rows)

    enc_flat, dec_flat = pl.pallas_call(
        _encoder_kernel,
        out_shape=(
            jax.ShapeDtypeStruct((Bn * N_PATCH, HIDDEN_DIM), jnp.float32),
            jax.ShapeDtypeStruct((Bn * N_PATCH, DEC_W), jnp.float32),
        ),
        grid=(1,),                                   # single fused invocation
        in_specs=[
            _full_spec((rows, PATCH_IN)),            # patches (+zero cls rows)
            _full_spec((rows, HIDDEN_DIM)),          # base
            _full_spec((rows, rows)),                # attn_bias
            _full_spec((PATCH_IN, HIDDEN_DIM)),      # patch_w
            _full_spec((DEPTH, HIDDEN_DIM, 3 * HIDDEN_DIM)),   # qkv_w
            _full_spec((DEPTH, 1, 3 * HIDDEN_DIM)),            # qkv_b
            _full_spec((DEPTH, HIDDEN_DIM, HIDDEN_DIM)),       # proj_w
            _full_spec((DEPTH, 1, HIDDEN_DIM)),                # proj_b
            _full_spec((DEPTH, HIDDEN_DIM, MLP_DIM)),          # fc1_w
            _full_spec((DEPTH, 1, MLP_DIM)),                   # fc1_b
            _full_spec((DEPTH, MLP_DIM, HIDDEN_DIM)),          # fc2_w
            _full_spec((DEPTH, 1, HIDDEN_DIM)),                # fc2_b
            _full_spec((1, HIDDEN_DIM)),                       # norm_g
            _full_spec((1, HIDDEN_DIM)),                       # norm_b
            _full_spec((HIDDEN_DIM, DEC_W)),                   # fc_w
            _full_spec((1, DEC_W)),                            # fc_b
        ],
        out_specs=[
            _full_spec((Bn * N_PATCH, HIDDEN_DIM)),
            _full_spec((Bn * N_PATCH, DEC_W)),
        ],
        compiler_params=pltpu.CompilerParams(
            dimension_semantics=("arbitrary",)),
    )(patches_tok, base, attn_bias, params["patch_w"],
      params["qkv_w"], params["qkv_b"], params["proj_w"], params["proj_b"],
      params["fc1_w"], params["fc1_b"], params["fc2_w"], params["fc2_b"],
      params["norm_g"], params["norm_b"], params["fc_w"], params["fc_b"])

    enc = enc_flat.reshape(Bn, N_PATCH, HIDDEN_DIM)

    # rearrange 'b (h w) (p1 p2 c) -> b c (h p1) (w p2)'  (layout glue; kernel output is
    # already lane-dense at width DEC_W=128)
    p1, p2 = DECODE_SCALE
    dec = (
        dec_flat.reshape(Bn, h, w, p1, p2, HIDDEN_DIM)
                .transpose(0, 5, 1, 3, 2, 4)                 # (B, C, h, p1, w, p2)
                .reshape(Bn, HIDDEN_DIM, h * p1, w * p2)
    )
    return enc, dec


if __name__ == "__main__":
    key = jax.random.PRNGKey(0)
    pkey, xkey = jax.random.split(key)
    params = prepare_params(init_params(pkey))
    x = jax.random.normal(xkey, (B, IN_CHANS, IMAGE_SIZE[0], IMAGE_SIZE[1]), jnp.float32)

    fwd = jax.jit(encoder2d_forward)
    encode_x, dec = fwd(params, x)
    jax.block_until_ready((encode_x, dec))

    assert encode_x.shape == (B, N_PATCH, HIDDEN_DIM)
    assert dec.shape == (B, HIDDEN_DIM,
                         NUM_PS[0] * DECODE_SCALE[0], NUM_PS[1] * DECODE_SCALE[1])
    assert encode_x.dtype == jnp.float32 and dec.dtype == jnp.float32
    assert bool(jnp.all(jnp.isfinite(encode_x))) and bool(jnp.all(jnp.isfinite(dec)))
    print("KERNEL_OK")
</pallas_src>

<mosaic_0001>
module attributes {stable_mosaic.version = 11 : i64} {
  func.func @_encoder_kernel(%arg0: i32, %arg1: memref<10x192xbf16, #tpu.memory_space<vmem>>, %arg2: memref<10x32xf32, #tpu.memory_space<vmem>>, %arg3: memref<10x10xf32, #tpu.memory_space<vmem>>, %arg4: memref<192x32xbf16, #tpu.memory_space<vmem>>, %arg5: memref<2x32x96xbf16, #tpu.memory_space<vmem>>, %arg6: memref<2x1x96xf32, #tpu.memory_space<vmem>>, %arg7: memref<2x32x32xbf16, #tpu.memory_space<vmem>>, %arg8: memref<2x1x32xf32, #tpu.memory_space<vmem>>, %arg9: memref<2x32x128xbf16, #tpu.memory_space<vmem>>, %arg10: memref<2x1x128xf32, #tpu.memory_space<vmem>>, %arg11: memref<2x128x32xbf16, #tpu.memory_space<vmem>>, %arg12: memref<2x1x32xf32, #tpu.memory_space<vmem>>, %arg13: memref<1x32xf32, #tpu.memory_space<vmem>>, %arg14: memref<1x32xf32, #tpu.memory_space<vmem>>, %arg15: memref<32x128xbf16, #tpu.memory_space<vmem>>, %arg16: memref<1x128xf32, #tpu.memory_space<vmem>>, %arg17: memref<8x32xf32, #tpu.memory_space<vmem>>, %arg18: memref<8x128xf32, #tpu.memory_space<vmem>>) attributes {dimension_semantics = [#tpu.dimension_semantics<arbitrary>], iteration_bounds = array<i64: 1>, scalar_prefetch = 0 : i64, scratch_operands = 0 : i64, tpu.core_type = #tpu.core_type<tc>, window_params = [{pipeline_mode = #tpu.pipeline_mode<synchronous>, transform_indices = @transform_0, window_bounds = array<i64: 10, 192>}, {pipeline_mode = #tpu.pipeline_mode<synchronous>, transform_indices = @transform_1, window_bounds = array<i64: 10, 32>}, {pipeline_mode = #tpu.pipeline_mode<synchronous>, transform_indices = @transform_2, window_bounds = array<i64: 10, 10>}, {pipeline_mode = #tpu.pipeline_mode<synchronous>, transform_indices = @transform_3, window_bounds = array<i64: 192, 32>}, {pipeline_mode = #tpu.pipeline_mode<synchronous>, transform_indices = @transform_4, window_bounds = array<i64: 2, 32, 96>}, {pipeline_mode = #tpu.pipeline_mode<synchronous>, transform_indices = @transform_5, window_bounds = array<i64: 2, 1, 96>}, {pipeline_mode = #tpu.pipeline_mode<synchronous>, transform_indices = @transform_6, window_bounds = array<i64: 2, 32, 32>}, {pipeline_mode = #tpu.pipeline_mode<synchronous>, transform_indices = @transform_7, window_bounds = array<i64: 2, 1, 32>}, {pipeline_mode = #tpu.pipeline_mode<synchronous>, transform_indices = @transform_8, window_bounds = array<i64: 2, 32, 128>}, {pipeline_mode = #tpu.pipeline_mode<synchronous>, transform_indices = @transform_9, window_bounds = array<i64: 2, 1, 128>}, {pipeline_mode = #tpu.pipeline_mode<synchronous>, transform_indices = @transform_10, window_bounds = array<i64: 2, 128, 32>}, {pipeline_mode = #tpu.pipeline_mode<synchronous>, transform_indices = @transform_11, window_bounds = array<i64: 2, 1, 32>}, {pipeline_mode = #tpu.pipeline_mode<synchronous>, transform_indices = @transform_12, window_bounds = array<i64: 1, 32>}, {pipeline_mode = #tpu.pipeline_mode<synchronous>, transform_indices = @transform_13, window_bounds = array<i64: 1, 32>}, {pipeline_mode = #tpu.pipeline_mode<synchronous>, transform_indices = @transform_14, window_bounds = array<i64: 32, 128>}, {pipeline_mode = #tpu.pipeline_mode<synchronous>, transform_indices = @transform_15, window_bounds = array<i64: 1, 128>}, {pipeline_mode = #tpu.pipeline_mode<synchronous>, transform_indices = @transform_16, window_bounds = array<i64: 8, 32>}, {pipeline_mode = #tpu.pipeline_mode<synchronous>, transform_indices = @transform_17, window_bounds = array<i64: 8, 128>}]} {
    %c0 = arith.constant 0 : index
    %c0_0 = arith.constant 0 : index
    %0 = vector.load %arg3[%c0, %c0_0] : memref<10x10xf32, #tpu.memory_space<vmem>>, vector<10x10xf32>
    %c0_1 = arith.constant 0 : index
    %c0_2 = arith.constant 0 : index
    %1 = vector.load %arg1[%c0_1, %c0_2] : memref<10x192xbf16, #tpu.memory_space<vmem>>, vector<10x192xbf16>
    %c0_3 = arith.constant 0 : index
    %c0_4 = arith.constant 0 : index
    %2 = vector.load %arg4[%c0_3, %c0_4] : memref<192x32xbf16, #tpu.memory_space<vmem>>, vector<192x32xbf16>
    %cst = arith.constant dense<0.000000e+00> : vector<10x32xf32>
    %3 = tpu.matmul %1, %2, %cst {dimension_numbers = #tpu.dot_dimension_numbers<[1], [0], [0], [1], [0, 0, 1, 1], [], []>} : vector<10x192xbf16>, vector<192x32xbf16>, vector<10x32xf32> -> vector<10x32xf32>
    %c0_5 = arith.constant 0 : index
    %c0_6 = arith.constant 0 : index
    %4 = vector.load %arg2[%c0_5, %c0_6] : memref<10x32xf32, #tpu.memory_space<vmem>>, vector<10x32xf32>
    %5 = arith.addf %3, %4 : vector<10x32xf32>
    %cst_7 = arith.constant dense<0.000000e+00> : vector<10xf32>
    %6 = vector.multi_reduction <add>, %5, %cst_7 [1] : vector<10x32xf32> to vector<10xf32>
    %7 = vector.shape_cast %6 : vector<10xf32> to vector<10x1xf32>
    %cst_8 = arith.constant 3.200000e+01 : f32
    %8 = vector.broadcast %cst_8 : f32 to vector<10x1xf32>
    %9 = arith.divf %7, %8 : vector<10x1xf32>
    %10 = vector.broadcast %9 : vector<10x1xf32> to vector<10x32xf32>
    %11 = arith.subf %5, %10 : vector<10x32xf32>
    %12 = arith.mulf %11, %11 : vector<10x32xf32>
    %cst_9 = arith.constant dense<0.000000e+00> : vector<10xf32>
    %13 = vector.multi_reduction <add>, %12, %cst_9 [1] : vector<10x32xf32> to vector<10xf32>
    %14 = vector.shape_cast %13 : vector<10xf32> to vector<10x1xf32>
    %cst_10 = arith.constant 3.200000e+01 : f32
    %15 = vector.broadcast %cst_10 : f32 to vector<10x1xf32>
    %16 = arith.divf %14, %15 : vector<10x1xf32>
    %cst_11 = arith.constant 9.99999997E-7 : f32
    %17 = vector.broadcast %cst_11 : f32 to vector<10x1xf32>
    %18 = arith.addf %16, %17 : vector<10x1xf32>
    %19 = math.rsqrt %18 : vector<10x1xf32>
    %20 = vector.broadcast %19 : vector<10x1xf32> to vector<10x32xf32>
    %21 = arith.mulf %11, %20 : vector<10x32xf32>
    %22 = arith.truncf %21 : vector<10x32xf32> to vector<10x32xbf16>
    %c0_12 = arith.constant 0 : index
    %c0_13 = arith.constant 0 : index
    %c0_14 = arith.constant 0 : index
    %23 = vector.load %arg5[%c0_12, %c0_13, %c0_14] : memref<2x32x96xbf16, #tpu.memory_space<vmem>>, vector<1x32x96xbf16>
    %24 = vector.shape_cast %23 : vector<1x32x96xbf16> to vector<32x96xbf16>
    %cst_15 = arith.constant dense<0.000000e+00> : vector<10x96xf32>
    %25 = tpu.matmul %22, %24, %cst_15 {dimension_numbers = #tpu.dot_dimension_numbers<[1], [0], [0], [1], [0, 0, 1, 1], [], []>} : vector<10x32xbf16>, vector<32x96xbf16>, vector<10x96xf32> -> vector<10x96xf32>
    %c0_16 = arith.constant 0 : index
    %c0_17 = arith.constant 0 : index
    %c0_18 = arith.constant 0 : index
    %26 = vector.load %arg6[%c0_16, %c0_17, %c0_18] : memref<2x1x96xf32, #tpu.memory_space<vmem>>, vector<1x1x96xf32>
    %27 = vector.shape_cast %26 : vector<1x1x96xf32> to vector<1x96xf32>
    %28 = vector.broadcast %27 : vector<1x96xf32> to vector<10x96xf32>
    %29 = arith.addf %25, %28 : vector<10x96xf32>
    %30 = vector.extract_strided_slice %29 {offsets = [0, 0], sizes = [10, 8], strides = [1, 1]} : vector<10x96xf32> to vector<10x8xf32>
    %31 = vector.extract_strided_slice %29 {offsets = [0, 32], sizes = [10, 8], strides = [1, 1]} : vector<10x96xf32> to vector<10x8xf32>
    %32 = vector.extract_strided_slice %29 {offsets = [0, 64], sizes = [10, 8], strides = [1, 1]} : vector<10x96xf32> to vector<10x8xf32>
    %cst_19 = arith.constant dense<0.000000e+00> : vector<10x10xf32>
    %33 = tpu.matmul %30, %31, %cst_19 {dimension_numbers = #tpu.dot_dimension_numbers<[1], [1], [0], [0], [0, 0, 1, 0], [], []>} : vector<10x8xf32>, vector<10x8xf32>, vector<10x10xf32> -> vector<10x10xf32>
    %cst_20 = arith.constant 0.353553385 : f32
    %34 = vector.broadcast %cst_20 : f32 to vector<10x10xf32>
    %35 = arith.mulf %33, %34 : vector<10x10xf32>
    %36 = arith.addf %35, %0 : vector<10x10xf32>
    %cst_21 = arith.constant dense<0xFF800000> : vector<10xf32>
    %37 = vector.multi_reduction <maximumf>, %36, %cst_21 [1] : vector<10x10xf32> to vector<10xf32>
    %38 = vector.shape_cast %37 : vector<10xf32> to vector<10x1xf32>
    %39 = vector.broadcast %38 : vector<10x1xf32> to vector<10x10xf32>
    %40 = arith.subf %36, %39 : vector<10x10xf32>
    %41 = math.exp %40 : vector<10x10xf32>
    %cst_22 = arith.constant dense<0.000000e+00> : vector<10xf32>
    %42 = vector.multi_reduction <add>, %41, %cst_22 [1] : vector<10x10xf32> to vector<10xf32>
    %43 = vector.shape_cast %42 : vector<10xf32> to vector<10x1xf32>
    %44 = vector.broadcast %43 : vector<10x1xf32> to vector<10x10xf32>
    %45 = arith.divf %41, %44 : vector<10x10xf32>
    %cst_23 = arith.constant dense<0.000000e+00> : vector<10x8xf32>
    %46 = tpu.matmul %45, %32, %cst_23 {dimension_numbers = #tpu.dot_dimension_numbers<[1], [0], [0], [1], [0, 0, 1, 1], [], []>} : vector<10x10xf32>, vector<10x8xf32>, vector<10x8xf32> -> vector<10x8xf32>
    %47 = vector.extract_strided_slice %29 {offsets = [0, 8], sizes = [10, 8], strides = [1, 1]} : vector<10x96xf32> to vector<10x8xf32>
    %48 = vector.extract_strided_slice %29 {offsets = [0, 40], sizes = [10, 8], strides = [1, 1]} : vector<10x96xf32> to vector<10x8xf32>
    %49 = vector.extract_strided_slice %29 {offsets = [0, 72], sizes = [10, 8], strides = [1, 1]} : vector<10x96xf32> to vector<10x8xf32>
    %cst_24 = arith.constant dense<0.000000e+00> : vector<10x10xf32>
    %50 = tpu.matmul %47, %48, %cst_24 {dimension_numbers = #tpu.dot_dimension_numbers<[1], [1], [0], [0], [0, 0, 1, 0], [], []>} : vector<10x8xf32>, vector<10x8xf32>, vector<10x10xf32> -> vector<10x10xf32>
    %cst_25 = arith.constant 0.353553385 : f32
    %51 = vector.broadcast %cst_25 : f32 to vector<10x10xf32>
    %52 = arith.mulf %50, %51 : vector<10x10xf32>
    %53 = arith.addf %52, %0 : vector<10x10xf32>
    %cst_26 = arith.constant dense<0xFF800000> : vector<10xf32>
    %54 = vector.multi_reduction <maximumf>, %53, %cst_26 [1] : vector<10x10xf32> to vector<10xf32>
    %55 = vector.shape_cast %54 : vector<10xf32> to vector<10x1xf32>
    %56 = vector.broadcast %55 : vector<10x1xf32> to vector<10x10xf32>
    %57 = arith.subf %53, %56 : vector<10x10xf32>
    %58 = math.exp %57 : vector<10x10xf32>
    %cst_27 = arith.constant dense<0.000000e+00> : vector<10xf32>
    %59 = vector.multi_reduction <add>, %58, %cst_27 [1] : vector<10x10xf32> to vector<10xf32>
    %60 = vector.shape_cast %59 : vector<10xf32> to vector<10x1xf32>
    %61 = vector.broadcast %60 : vector<10x1xf32> to vector<10x10xf32>
    %62 = arith.divf %58, %61 : vector<10x10xf32>
    %cst_28 = arith.constant dense<0.000000e+00> : vector<10x8xf32>
    %63 = tpu.matmul %62, %49, %cst_28 {dimension_numbers = #tpu.dot_dimension_numbers<[1], [0], [0], [1], [0, 0, 1, 1], [], []>} : vector<10x10xf32>, vector<10x8xf32>, vector<10x8xf32> -> vector<10x8xf32>
    %64 = vector.extract_strided_slice %29 {offsets = [0, 16], sizes = [10, 8], strides = [1, 1]} : vector<10x96xf32> to vector<10x8xf32>
    %65 = vector.extract_strided_slice %29 {offsets = [0, 48], sizes = [10, 8], strides = [1, 1]} : vector<10x96xf32> to vector<10x8xf32>
    %66 = vector.extract_strided_slice %29 {offsets = [0, 80], sizes = [10, 8], strides = [1, 1]} : vector<10x96xf32> to vector<10x8xf32>
    %cst_29 = arith.constant dense<0.000000e+00> : vector<10x10xf32>
    %67 = tpu.matmul %64, %65, %cst_29 {dimension_numbers = #tpu.dot_dimension_numbers<[1], [1], [0], [0], [0, 0, 1, 0], [], []>} : vector<10x8xf32>, vector<10x8xf32>, vector<10x10xf32> -> vector<10x10xf32>
    %cst_30 = arith.constant 0.353553385 : f32
    %68 = vector.broadcast %cst_30 : f32 to vector<10x10xf32>
    %69 = arith.mulf %67, %68 : vector<10x10xf32>
    %70 = arith.addf %69, %0 : vector<10x10xf32>
    %cst_31 = arith.constant dense<0xFF800000> : vector<10xf32>
    %71 = vector.multi_reduction <maximumf>, %70, %cst_31 [1] : vector<10x10xf32> to vector<10xf32>
    %72 = vector.shape_cast %71 : vector<10xf32> to vector<10x1xf32>
    %73 = vector.broadcast %72 : vector<10x1xf32> to vector<10x10xf32>
    %74 = arith.subf %70, %73 : vector<10x10xf32>
    %75 = math.exp %74 : vector<10x10xf32>
    %cst_32 = arith.constant dense<0.000000e+00> : vector<10xf32>
    %76 = vector.multi_reduction <add>, %75, %cst_32 [1] : vector<10x10xf32> to vector<10xf32>
    %77 = vector.shape_cast %76 : vector<10xf32> to vector<10x1xf32>
    %78 = vector.broadcast %77 : vector<10x1xf32> to vector<10x10xf32>
    %79 = arith.divf %75, %78 : vector<10x10xf32>
    %cst_33 = arith.constant dense<0.000000e+00> : vector<10x8xf32>
    %80 = tpu.matmul %79, %66, %cst_33 {dimension_numbers = #tpu.dot_dimension_numbers<[1], [0], [0], [1], [0, 0, 1, 1], [], []>} : vector<10x10xf32>, vector<10x8xf32>, vector<10x8xf32> -> vector<10x8xf32>
    %81 = vector.extract_strided_slice %29 {offsets = [0, 24], sizes = [10, 8], strides = [1, 1]} : vector<10x96xf32> to vector<10x8xf32>
    %82 = vector.extract_strided_slice %29 {offsets = [0, 56], sizes = [10, 8], strides = [1, 1]} : vector<10x96xf32> to vector<10x8xf32>
    %83 = vector.extract_strided_slice %29 {offsets = [0, 88], sizes = [10, 8], strides = [1, 1]} : vector<10x96xf32> to vector<10x8xf32>
    %cst_34 = arith.constant dense<0.000000e+00> : vector<10x10xf32>
    %84 = tpu.matmul %81, %82, %cst_34 {dimension_numbers = #tpu.dot_dimension_numbers<[1], [1], [0], [0], [0, 0, 1, 0], [], []>} : vector<10x8xf32>, vector<10x8xf32>, vector<10x10xf32> -> vector<10x10xf32>
    %cst_35 = arith.constant 0.353553385 : f32
    %85 = vector.broadcast %cst_35 : f32 to vector<10x10xf32>
    %86 = arith.mulf %84, %85 : vector<10x10xf32>
    %87 = arith.addf %86, %0 : vector<10x10xf32>
    %cst_36 = arith.constant dense<0xFF800000> : vector<10xf32>
    %88 = vector.multi_reduction <maximumf>, %87, %cst_36 [1] : vector<10x10xf32> to vector<10xf32>
    %89 = vector.shape_cast %88 : vector<10xf32> to vector<10x1xf32>
    %90 = vector.broadcast %89 : vector<10x1xf32> to vector<10x10xf32>
    %91 = arith.subf %87, %90 : vector<10x10xf32>
    %92 = math.exp %91 : vector<10x10xf32>
    %cst_37 = arith.constant dense<0.000000e+00> : vector<10xf32>
    %93 = vector.multi_reduction <add>, %92, %cst_37 [1] : vector<10x10xf32> to vector<10xf32>
    %94 = vector.shape_cast %93 : vector<10xf32> to vector<10x1xf32>
    %95 = vector.broadcast %94 : vector<10x1xf32> to vector<10x10xf32>
    %96 = arith.divf %92, %95 : vector<10x10xf32>
    %cst_38 = arith.constant dense<0.000000e+00> : vector<10x8xf32>
    %97 = tpu.matmul %96, %83, %cst_38 {dimension_numbers = #tpu.dot_dimension_numbers<[1], [0], [0], [1], [0, 0, 1, 1], [], []>} : vector<10x10xf32>, vector<10x8xf32>, vector<10x8xf32> -> vector<10x8xf32>
    %98 = tpu.concatenate %46, %63, %80, %97 in 1 : vector<10x8xf32>, vector<10x8xf32>, vector<10x8xf32>, vector<10x8xf32> -> vector<10x32xf32>
    %99 = arith.truncf %98 : vector<10x32xf32> to vector<10x32xbf16>
    %c0_39 = arith.constant 0 : index
    %c0_40 = arith.constant 0 : index
    %c0_41 = arith.constant 0 : index
    %100 = vector.load %arg7[%c0_39, %c0_40, %c0_41] : memref<2x32x32xbf16, #tpu.memory_space<vmem>>, vector<1x32x32xbf16>
    %101 = vector.shape_cast %100 : vector<1x32x32xbf16> to vector<32x32xbf16>
    %cst_42 = arith.constant dense<0.000000e+00> : vector<10x32xf32>
    %102 = tpu.matmul %99, %101, %cst_42 {dimension_numbers = #tpu.dot_dimension_numbers<[1], [0], [0], [1], [0, 0, 1, 1], [], []>} : vector<10x32xbf16>, vector<32x32xbf16>, vector<10x32xf32> -> vector<10x32xf32>
    %c0_43 = arith.constant 0 : index
    %c0_44 = arith.constant 0 : index
    %c0_45 = arith.constant 0 : index
    %103 = vector.load %arg8[%c0_43, %c0_44, %c0_45] : memref<2x1x32xf32, #tpu.memory_space<vmem>>, vector<1x1x32xf32>
    %104 = vector.shape_cast %103 : vector<1x1x32xf32> to vector<1x32xf32>
    %105 = vector.broadcast %104 : vector<1x32xf32> to vector<10x32xf32>
    %106 = arith.addf %102, %105 : vector<10x32xf32>
    %107 = arith.addf %5, %106 : vector<10x32xf32>
    %cst_46 = arith.constant dense<0.000000e+00> : vector<10xf32>
    %108 = vector.multi_reduction <add>, %107, %cst_46 [1] : vector<10x32xf32> to vector<10xf32>
    %109 = vector.shape_cast %108 : vector<10xf32> to vector<10x1xf32>
    %cst_47 = arith.constant 3.200000e+01 : f32
    %110 = vector.broadcast %cst_47 : f32 to vector<10x1xf32>
    %111 = arith.divf %109, %110 : vector<10x1xf32>
    %112 = vector.broadcast %111 : vector<10x1xf32> to vector<10x32xf32>
    %113 = arith.subf %107, %112 : vector<10x32xf32>
    %114 = arith.mulf %113, %113 : vector<10x32xf32>
    %cst_48 = arith.constant dense<0.000000e+00> : vector<10xf32>
    %115 = vector.multi_reduction <add>, %114, %cst_48 [1] : vector<10x32xf32> to vector<10xf32>
    %116 = vector.shape_cast %115 : vector<10xf32> to vector<10x1xf32>
    %cst_49 = arith.constant 3.200000e+01 : f32
    %117 = vector.broadcast %cst_49 : f32 to vector<10x1xf32>
    %118 = arith.divf %116, %117 : vector<10x1xf32>
    %cst_50 = arith.constant 9.99999997E-7 : f32
    %119 = vector.broadcast %cst_50 : f32 to vector<10x1xf32>
    %120 = arith.addf %118, %119 : vector<10x1xf32>
    %121 = math.rsqrt %120 : vector<10x1xf32>
    %122 = vector.broadcast %121 : vector<10x1xf32> to vector<10x32xf32>
    %123 = arith.mulf %113, %122 : vector<10x32xf32>
    %124 = arith.truncf %123 : vector<10x32xf32> to vector<10x32xbf16>
    %c0_51 = arith.constant 0 : index
    %c0_52 = arith.constant 0 : index
    %c0_53 = arith.constant 0 : index
    %125 = vector.load %arg9[%c0_51, %c0_52, %c0_53] : memref<2x32x128xbf16, #tpu.memory_space<vmem>>, vector<1x32x128xbf16>
    %126 = vector.shape_cast %125 : vector<1x32x128xbf16> to vector<32x128xbf16>
    %cst_54 = arith.constant dense<0.000000e+00> : vector<10x128xf32>
    %127 = tpu.matmul %124, %126, %cst_54 {dimension_numbers = #tpu.dot_dimension_numbers<[1], [0], [0], [1], [0, 0, 1, 1], [], []>} : vector<10x32xbf16>, vector<32x128xbf16>, vector<10x128xf32> -> vector<10x128xf32>
    %c0_55 = arith.constant 0 : index
    %c0_56 = arith.constant 0 : index
    %c0_57 = arith.constant 0 : index
    %128 = vector.load %arg10[%c0_55, %c0_56, %c0_57] : memref<2x1x128xf32, #tpu.memory_space<vmem>>, vector<1x1x128xf32>
    %129 = vector.shape_cast %128 : vector<1x1x128xf32> to vector<1x128xf32>
    %130 = vector.broadcast %129 : vector<1x128xf32> to vector<10x128xf32>
    %131 = arith.addf %127, %130 : vector<10x128xf32>
    %132 = arith.mulf %131, %131 : vector<10x128xf32>
    %133 = arith.mulf %131, %132 : vector<10x128xf32>
    %cst_58 = arith.constant 4.471500e-02 : f32
    %134 = vector.broadcast %cst_58 : f32 to vector<10x128xf32>
    %135 = arith.mulf %134, %133 : vector<10x128xf32>
    %136 = arith.addf %131, %135 : vector<10x128xf32>
    %cst_59 = arith.constant 0.797884583 : f32
    %137 = vector.broadcast %cst_59 : f32 to vector<10x128xf32>
    %138 = arith.mulf %137, %136 : vector<10x128xf32>
    %139 = math.tanh %138 : vector<10x128xf32>
    %cst_60 = arith.constant 1.000000e+00 : f32
    %140 = vector.broadcast %cst_60 : f32 to vector<10x128xf32>
    %141 = arith.addf %140, %139 : vector<10x128xf32>
    %cst_61 = arith.constant 5.000000e-01 : f32
    %142 = vector.broadcast %cst_61 : f32 to vector<10x128xf32>
    %143 = arith.mulf %142, %141 : vector<10x128xf32>
    %144 = arith.mulf %131, %143 : vector<10x128xf32>
    %145 = arith.truncf %144 : vector<10x128xf32> to vector<10x128xbf16>
    %c0_62 = arith.constant 0 : index
    %c0_63 = arith.constant 0 : index
    %c0_64 = arith.constant 0 : index
    %146 = vector.load %arg11[%c0_62, %c0_63, %c0_64] : memref<2x128x32xbf16, #tpu.memory_space<vmem>>, vector<1x128x32xbf16>
    %147 = vector.shape_cast %146 : vector<1x128x32xbf16> to vector<128x32xbf16>
    %cst_65 = arith.constant dense<0.000000e+00> : vector<10x32xf32>
    %148 = tpu.matmul %145, %147, %cst_65 {dimension_numbers = #tpu.dot_dimension_numbers<[1], [0], [0], [1], [0, 0, 1, 1], [], []>} : vector<10x128xbf16>, vector<128x32xbf16>, vector<10x32xf32> -> vector<10x32xf32>
    %c0_66 = arith.constant 0 : index
    %c0_67 = arith.constant 0 : index
    %c0_68 = arith.constant 0 : index
    %149 = vector.load %arg12[%c0_66, %c0_67, %c0_68] : memref<2x1x32xf32, #tpu.memory_space<vmem>>, vector<1x1x32xf32>
    %150 = vector.shape_cast %149 : vector<1x1x32xf32> to vector<1x32xf32>
    %151 = vector.broadcast %150 : vector<1x32xf32> to vector<10x32xf32>
    %152 = arith.addf %148, %151 : vector<10x32xf32>
    %153 = arith.addf %107, %152 : vector<10x32xf32>
    %cst_69 = arith.constant dense<0.000000e+00> : vector<10xf32>
    %154 = vector.multi_reduction <add>, %153, %cst_69 [1] : vector<10x32xf32> to vector<10xf32>
    %155 = vector.shape_cast %154 : vector<10xf32> to vector<10x1xf32>
    %cst_70 = arith.constant 3.200000e+01 : f32
    %156 = vector.broadcast %cst_70 : f32 to vector<10x1xf32>
    %157 = arith.divf %155, %156 : vector<10x1xf32>
    %158 = vector.broadcast %157 : vector<10x1xf32> to vector<10x32xf32>
    %159 = arith.subf %153, %158 : vector<10x32xf32>
    %160 = arith.mulf %159, %159 : vector<10x32xf32>
    %cst_71 = arith.constant dense<0.000000e+00> : vector<10xf32>
    %161 = vector.multi_reduction <add>, %160, %cst_71 [1] : vector<10x32xf32> to vector<10xf32>
    %162 = vector.shape_cast %161 : vector<10xf32> to vector<10x1xf32>
    %cst_72 = arith.constant 3.200000e+01 : f32
    %163 = vector.broadcast %cst_72 : f32 to vector<10x1xf32>
    %164 = arith.divf %162, %163 : vector<10x1xf32>
    %cst_73 = arith.constant 9.99999997E-7 : f32
    %165 = vector.broadcast %cst_73 : f32 to vector<10x1xf32>
    %166 = arith.addf %164, %165 : vector<10x1xf32>
    %167 = math.rsqrt %166 : vector<10x1xf32>
    %168 = vector.broadcast %167 : vector<10x1xf32> to vector<10x32xf32>
    %169 = arith.mulf %159, %168 : vector<10x32xf32>
    %170 = arith.truncf %169 : vector<10x32xf32> to vector<10x32xbf16>
    %c1 = arith.constant 1 : index
    %c0_74 = arith.constant 0 : index
    %c0_75 = arith.constant 0 : index
    %171 = vector.load %arg5[%c1, %c0_74, %c0_75] : memref<2x32x96xbf16, #tpu.memory_space<vmem>>, vector<1x32x96xbf16>
    %172 = vector.shape_cast %171 : vector<1x32x96xbf16> to vector<32x96xbf16>
    %cst_76 = arith.constant dense<0.000000e+00> : vector<10x96xf32>
    %173 = tpu.matmul %170, %172, %cst_76 {dimension_numbers = #tpu.dot_dimension_numbers<[1], [0], [0], [1], [0, 0, 1, 1], [], []>} : vector<10x32xbf16>, vector<32x96xbf16>, vector<10x96xf32> -> vector<10x96xf32>
    %c1_77 = arith.constant 1 : index
    %c0_78 = arith.constant 0 : index
    %c0_79 = arith.constant 0 : index
    %174 = vector.load %arg6[%c1_77, %c0_78, %c0_79] : memref<2x1x96xf32, #tpu.memory_space<vmem>>, vector<1x1x96xf32>
    %175 = vector.shape_cast %174 : vector<1x1x96xf32> to vector<1x96xf32>
    %176 = vector.broadcast %175 : vector<1x96xf32> to vector<10x96xf32>
    %177 = arith.addf %173, %176 : vector<10x96xf32>
    %178 = vector.extract_strided_slice %177 {offsets = [0, 0], sizes = [10, 8], strides = [1, 1]} : vector<10x96xf32> to vector<10x8xf32>
    %179 = vector.extract_strided_slice %177 {offsets = [0, 32], sizes = [10, 8], strides = [1, 1]} : vector<10x96xf32> to vector<10x8xf32>
    %180 = vector.extract_strided_slice %177 {offsets = [0, 64], sizes = [10, 8], strides = [1, 1]} : vector<10x96xf32> to vector<10x8xf32>
    %cst_80 = arith.constant dense<0.000000e+00> : vector<10x10xf32>
    %181 = tpu.matmul %178, %179, %cst_80 {dimension_numbers = #tpu.dot_dimension_numbers<[1], [1], [0], [0], [0, 0, 1, 0], [], []>} : vector<10x8xf32>, vector<10x8xf32>, vector<10x10xf32> -> vector<10x10xf32>
    %cst_81 = arith.constant 0.353553385 : f32
    %182 = vector.broadcast %cst_81 : f32 to vector<10x10xf32>
    %183 = arith.mulf %181, %182 : vector<10x10xf32>
    %184 = arith.addf %183, %0 : vector<10x10xf32>
    %cst_82 = arith.constant dense<0xFF800000> : vector<10xf32>
    %185 = vector.multi_reduction <maximumf>, %184, %cst_82 [1] : vector<10x10xf32> to vector<10xf32>
    %186 = vector.shape_cast %185 : vector<10xf32> to vector<10x1xf32>
    %187 = vector.broadcast %186 : vector<10x1xf32> to vector<10x10xf32>
    %188 = arith.subf %184, %187 : vector<10x10xf32>
    %189 = math.exp %188 : vector<10x10xf32>
    %cst_83 = arith.constant dense<0.000000e+00> : vector<10xf32>
    %190 = vector.multi_reduction <add>, %189, %cst_83 [1] : vector<10x10xf32> to vector<10xf32>
    %191 = vector.shape_cast %190 : vector<10xf32> to vector<10x1xf32>
    %192 = vector.broadcast %191 : vector<10x1xf32> to vector<10x10xf32>
    %193 = arith.divf %189, %192 : vector<10x10xf32>
    %cst_84 = arith.constant dense<0.000000e+00> : vector<10x8xf32>
    %194 = tpu.matmul %193, %180, %cst_84 {dimension_numbers = #tpu.dot_dimension_numbers<[1], [0], [0], [1], [0, 0, 1, 1], [], []>} : vector<10x10xf32>, vector<10x8xf32>, vector<10x8xf32> -> vector<10x8xf32>
    %195 = vector.extract_strided_slice %177 {offsets = [0, 8], sizes = [10, 8], strides = [1, 1]} : vector<10x96xf32> to vector<10x8xf32>
    %196 = vector.extract_strided_slice %177 {offsets = [0, 40], sizes = [10, 8], strides = [1, 1]} : vector<10x96xf32> to vector<10x8xf32>
    %197 = vector.extract_strided_slice %177 {offsets = [0, 72], sizes = [10, 8], strides = [1, 1]} : vector<10x96xf32> to vector<10x8xf32>
    %cst_85 = arith.constant dense<0.000000e+00> : vector<10x10xf32>
    %198 = tpu.matmul %195, %196, %cst_85 {dimension_numbers = #tpu.dot_dimension_numbers<[1], [1], [0], [0], [0, 0, 1, 0], [], []>} : vector<10x8xf32>, vector<10x8xf32>, vector<10x10xf32> -> vector<10x10xf32>
    %cst_86 = arith.constant 0.353553385 : f32
    %199 = vector.broadcast %cst_86 : f32 to vector<10x10xf32>
    %200 = arith.mulf %198, %199 : vector<10x10xf32>
    %201 = arith.addf %200, %0 : vector<10x10xf32>
    %cst_87 = arith.constant dense<0xFF800000> : vector<10xf32>
    %202 = vector.multi_reduction <maximumf>, %201, %cst_87 [1] : vector<10x10xf32> to vector<10xf32>
    %203 = vector.shape_cast %202 : vector<10xf32> to vector<10x1xf32>
    %204 = vector.broadcast %203 : vector<10x1xf32> to vector<10x10xf32>
    %205 = arith.subf %201, %204 : vector<10x10xf32>
    %206 = math.exp %205 : vector<10x10xf32>
    %cst_88 = arith.constant dense<0.000000e+00> : vector<10xf32>
    %207 = vector.multi_reduction <add>, %206, %cst_88 [1] : vector<10x10xf32> to vector<10xf32>
    %208 = vector.shape_cast %207 : vector<10xf32> to vector<10x1xf32>
    %209 = vector.broadcast %208 : vector<10x1xf32> to vector<10x10xf32>
    %210 = arith.divf %206, %209 : vector<10x10xf32>
    %cst_89 = arith.constant dense<0.000000e+00> : vector<10x8xf32>
    %211 = tpu.matmul %210, %197, %cst_89 {dimension_numbers = #tpu.dot_dimension_numbers<[1], [0], [0], [1], [0, 0, 1, 1], [], []>} : vector<10x10xf32>, vector<10x8xf32>, vector<10x8xf32> -> vector<10x8xf32>
    %212 = vector.extract_strided_slice %177 {offsets = [0, 16], sizes = [10, 8], strides = [1, 1]} : vector<10x96xf32> to vector<10x8xf32>
    %213 = vector.extract_strided_slice %177 {offsets = [0, 48], sizes = [10, 8], strides = [1, 1]} : vector<10x96xf32> to vector<10x8xf32>
    %214 = vector.extract_strided_slice %177 {offsets = [0, 80], sizes = [10, 8], strides = [1, 1]} : vector<10x96xf32> to vector<10x8xf32>
    %cst_90 = arith.constant dense<0.000000e+00> : vector<10x10xf32>
    %215 = tpu.matmul %212, %213, %cst_90 {dimension_numbers = #tpu.dot_dimension_numbers<[1], [1], [0], [0], [0, 0, 1, 0], [], []>} : vector<10x8xf32>, vector<10x8xf32>, vector<10x10xf32> -> vector<10x10xf32>
    %cst_91 = arith.constant 0.353553385 : f32
    %216 = vector.broadcast %cst_91 : f32 to vector<10x10xf32>
    %217 = arith.mulf %215, %216 : vector<10x10xf32>
    %218 = arith.addf %217, %0 : vector<10x10xf32>
    %cst_92 = arith.constant dense<0xFF800000> : vector<10xf32>
    %219 = vector.multi_reduction <maximumf>, %218, %cst_92 [1] : vector<10x10xf32> to vector<10xf32>
    %220 = vector.shape_cast %219 : vector<10xf32> to vector<10x1xf32>
    %221 = vector.broadcast %220 : vector<10x1xf32> to vector<10x10xf32>
    %222 = arith.subf %218, %221 : vector<10x10xf32>
    %223 = math.exp %222 : vector<10x10xf32>
    %cst_93 = arith.constant dense<0.000000e+00> : vector<10xf32>
    %224 = vector.multi_reduction <add>, %223, %cst_93 [1] : vector<10x10xf32> to vector<10xf32>
    %225 = vector.shape_cast %224 : vector<10xf32> to vector<10x1xf32>
    %226 = vector.broadcast %225 : vector<10x1xf32> to vector<10x10xf32>
    %227 = arith.divf %223, %226 : vector<10x10xf32>
    %cst_94 = arith.constant dense<0.000000e+00> : vector<10x8xf32>
    %228 = tpu.matmul %227, %214, %cst_94 {dimension_numbers = #tpu.dot_dimension_numbers<[1], [0], [0], [1], [0, 0, 1, 1], [], []>} : vector<10x10xf32>, vector<10x8xf32>, vector<10x8xf32> -> vector<10x8xf32>
    %229 = vector.extract_strided_slice %177 {offsets = [0, 24], sizes = [10, 8], strides = [1, 1]} : vector<10x96xf32> to vector<10x8xf32>
    %230 = vector.extract_strided_slice %177 {offsets = [0, 56], sizes = [10, 8], strides = [1, 1]} : vector<10x96xf32> to vector<10x8xf32>
    %231 = vector.extract_strided_slice %177 {offsets = [0, 88], sizes = [10, 8], strides = [1, 1]} : vector<10x96xf32> to vector<10x8xf32>
    %cst_95 = arith.constant dense<0.000000e+00> : vector<10x10xf32>
    %232 = tpu.matmul %229, %230, %cst_95 {dimension_numbers = #tpu.dot_dimension_numbers<[1], [1], [0], [0], [0, 0, 1, 0], [], []>} : vector<10x8xf32>, vector<10x8xf32>, vector<10x10xf32> -> vector<10x10xf32>
    %cst_96 = arith.constant 0.353553385 : f32
    %233 = vector.broadcast %cst_96 : f32 to vector<10x10xf32>
    %234 = arith.mulf %232, %233 : vector<10x10xf32>
    %235 = arith.addf %234, %0 : vector<10x10xf32>
    %cst_97 = arith.constant dense<0xFF800000> : vector<10xf32>
    %236 = vector.multi_reduction <maximumf>, %235, %cst_97 [1] : vector<10x10xf32> to vector<10xf32>
    %237 = vector.shape_cast %236 : vector<10xf32> to vector<10x1xf32>
    %238 = vector.broadcast %237 : vector<10x1xf32> to vector<10x10xf32>
    %239 = arith.subf %235, %238 : vector<10x10xf32>
    %240 = math.exp %239 : vector<10x10xf32>
    %cst_98 = arith.constant dense<0.000000e+00> : vector<10xf32>
    %241 = vector.multi_reduction <add>, %240, %cst_98 [1] : vector<10x10xf32> to vector<10xf32>
    %242 = vector.shape_cast %241 : vector<10xf32> to vector<10x1xf32>
    %243 = vector.broadcast %242 : vector<10x1xf32> to vector<10x10xf32>
    %244 = arith.divf %240, %243 : vector<10x10xf32>
    %cst_99 = arith.constant dense<0.000000e+00> : vector<10x8xf32>
    %245 = tpu.matmul %244, %231, %cst_99 {dimension_numbers = #tpu.dot_dimension_numbers<[1], [0], [0], [1], [0, 0, 1, 1], [], []>} : vector<10x10xf32>, vector<10x8xf32>, vector<10x8xf32> -> vector<10x8xf32>
    %246 = tpu.concatenate %194, %211, %228, %245 in 1 : vector<10x8xf32>, vector<10x8xf32>, vector<10x8xf32>, vector<10x8xf32> -> vector<10x32xf32>
    %247 = arith.truncf %246 : vector<10x32xf32> to vector<10x32xbf16>
    %c1_100 = arith.constant 1 : index
    %c0_101 = arith.constant 0 : index
    %c0_102 = arith.constant 0 : index
    %248 = vector.load %arg7[%c1_100, %c0_101, %c0_102] : memref<2x32x32xbf16, #tpu.memory_space<vmem>>, vector<1x32x32xbf16>
    %249 = vector.shape_cast %248 : vector<1x32x32xbf16> to vector<32x32xbf16>
    %cst_103 = arith.constant dense<0.000000e+00> : vector<10x32xf32>
    %250 = tpu.matmul %247, %249, %cst_103 {dimension_numbers = #tpu.dot_dimension_numbers<[1], [0], [0], [1], [0, 0, 1, 1], [], []>} : vector<10x32xbf16>, vector<32x32xbf16>, vector<10x32xf32> -> vector<10x32xf32>
    %c1_104 = arith.constant 1 : index
    %c0_105 = arith.constant 0 : index
    %c0_106 = arith.constant 0 : index
    %251 = vector.load %arg8[%c1_104, %c0_105, %c0_106] : memref<2x1x32xf32, #tpu.memory_space<vmem>>, vector<1x1x32xf32>
    %252 = vector.shape_cast %251 : vector<1x1x32xf32> to vector<1x32xf32>
    %253 = vector.broadcast %252 : vector<1x32xf32> to vector<10x32xf32>
    %254 = arith.addf %250, %253 : vector<10x32xf32>
    %255 = arith.addf %153, %254 : vector<10x32xf32>
    %cst_107 = arith.constant dense<0.000000e+00> : vector<10xf32>
    %256 = vector.multi_reduction <add>, %255, %cst_107 [1] : vector<10x32xf32> to vector<10xf32>
    %257 = vector.shape_cast %256 : vector<10xf32> to vector<10x1xf32>
    %cst_108 = arith.constant 3.200000e+01 : f32
    %258 = vector.broadcast %cst_108 : f32 to vector<10x1xf32>
    %259 = arith.divf %257, %258 : vector<10x1xf32>
    %260 = vector.broadcast %259 : vector<10x1xf32> to vector<10x32xf32>
    %261 = arith.subf %255, %260 : vector<10x32xf32>
    %262 = arith.mulf %261, %261 : vector<10x32xf32>
    %cst_109 = arith.constant dense<0.000000e+00> : vector<10xf32>
    %263 = vector.multi_reduction <add>, %262, %cst_109 [1] : vector<10x32xf32> to vector<10xf32>
    %264 = vector.shape_cast %263 : vector<10xf32> to vector<10x1xf32>
    %cst_110 = arith.constant 3.200000e+01 : f32
    %265 = vector.broadcast %cst_110 : f32 to vector<10x1xf32>
    %266 = arith.divf %264, %265 : vector<10x1xf32>
    %cst_111 = arith.constant 9.99999997E-7 : f32
    %267 = vector.broadcast %cst_111 : f32 to vector<10x1xf32>
    %268 = arith.addf %266, %267 : vector<10x1xf32>
    %269 = math.rsqrt %268 : vector<10x1xf32>
    %270 = vector.broadcast %269 : vector<10x1xf32> to vector<10x32xf32>
    %271 = arith.mulf %261, %270 : vector<10x32xf32>
    %272 = arith.truncf %271 : vector<10x32xf32> to vector<10x32xbf16>
    %c1_112 = arith.constant 1 : index
    %c0_113 = arith.constant 0 : index
    %c0_114 = arith.constant 0 : index
    %273 = vector.load %arg9[%c1_112, %c0_113, %c0_114] : memref<2x32x128xbf16, #tpu.memory_space<vmem>>, vector<1x32x128xbf16>
    %274 = vector.shape_cast %273 : vector<1x32x128xbf16> to vector<32x128xbf16>
    %cst_115 = arith.constant dense<0.000000e+00> : vector<10x128xf32>
    %275 = tpu.matmul %272, %274, %cst_115 {dimension_numbers = #tpu.dot_dimension_numbers<[1], [0], [0], [1], [0, 0, 1, 1], [], []>} : vector<10x32xbf16>, vector<32x128xbf16>, vector<10x128xf32> -> vector<10x128xf32>
    %c1_116 = arith.constant 1 : index
    %c0_117 = arith.constant 0 : index
    %c0_118 = arith.constant 0 : index
    %276 = vector.load %arg10[%c1_116, %c0_117, %c0_118] : memref<2x1x128xf32, #tpu.memory_space<vmem>>, vector<1x1x128xf32>
    %277 = vector.shape_cast %276 : vector<1x1x128xf32> to vector<1x128xf32>
    %278 = vector.broadcast %277 : vector<1x128xf32> to vector<10x128xf32>
    %279 = arith.addf %275, %278 : vector<10x128xf32>
    %280 = arith.mulf %279, %279 : vector<10x128xf32>
    %281 = arith.mulf %279, %280 : vector<10x128xf32>
    %cst_119 = arith.constant 4.471500e-02 : f32
    %282 = vector.broadcast %cst_119 : f32 to vector<10x128xf32>
    %283 = arith.mulf %282, %281 : vector<10x128xf32>
    %284 = arith.addf %279, %283 : vector<10x128xf32>
    %cst_120 = arith.constant 0.797884583 : f32
    %285 = vector.broadcast %cst_120 : f32 to vector<10x128xf32>
    %286 = arith.mulf %285, %284 : vector<10x128xf32>
    %287 = math.tanh %286 : vector<10x128xf32>
    %cst_121 = arith.constant 1.000000e+00 : f32
    %288 = vector.broadcast %cst_121 : f32 to vector<10x128xf32>
    %289 = arith.addf %288, %287 : vector<10x128xf32>
    %cst_122 = arith.constant 5.000000e-01 : f32
    %290 = vector.broadcast %cst_122 : f32 to vector<10x128xf32>
    %291 = arith.mulf %290, %289 : vector<10x128xf32>
    %292 = arith.mulf %279, %291 : vector<10x128xf32>
    %293 = arith.truncf %292 : vector<10x128xf32> to vector<10x128xbf16>
    %c1_123 = arith.constant 1 : index
    %c0_124 = arith.constant 0 : index
    %c0_125 = arith.constant 0 : index
    %294 = vector.load %arg11[%c1_123, %c0_124, %c0_125] : memref<2x128x32xbf16, #tpu.memory_space<vmem>>, vector<1x128x32xbf16>
    %295 = vector.shape_cast %294 : vector<1x128x32xbf16> to vector<128x32xbf16>
    %cst_126 = arith.constant dense<0.000000e+00> : vector<10x32xf32>
    %296 = tpu.matmul %293, %295, %cst_126 {dimension_numbers = #tpu.dot_dimension_numbers<[1], [0], [0], [1], [0, 0, 1, 1], [], []>} : vector<10x128xbf16>, vector<128x32xbf16>, vector<10x32xf32> -> vector<10x32xf32>
    %c1_127 = arith.constant 1 : index
    %c0_128 = arith.constant 0 : index
    %c0_129 = arith.constant 0 : index
    %297 = vector.load %arg12[%c1_127, %c0_128, %c0_129] : memref<2x1x32xf32, #tpu.memory_space<vmem>>, vector<1x1x32xf32>
    %298 = vector.shape_cast %297 : vector<1x1x32xf32> to vector<1x32xf32>
    %299 = vector.broadcast %298 : vector<1x32xf32> to vector<10x32xf32>
    %300 = arith.addf %296, %299 : vector<10x32xf32>
    %301 = arith.addf %255, %300 : vector<10x32xf32>
    %cst_130 = arith.constant dense<0.000000e+00> : vector<10xf32>
    %302 = vector.multi_reduction <add>, %301, %cst_130 [1] : vector<10x32xf32> to vector<10xf32>
    %303 = vector.shape_cast %302 : vector<10xf32> to vector<10x1xf32>
    %cst_131 = arith.constant 3.200000e+01 : f32
    %304 = vector.broadcast %cst_131 : f32 to vector<10x1xf32>
    %305 = arith.divf %303, %304 : vector<10x1xf32>
    %306 = vector.broadcast %305 : vector<10x1xf32> to vector<10x32xf32>
    %307 = arith.subf %301, %306 : vector<10x32xf32>
    %308 = arith.mulf %307, %307 : vector<10x32xf32>
    %cst_132 = arith.constant dense<0.000000e+00> : vector<10xf32>
    %309 = vector.multi_reduction <add>, %308, %cst_132 [1] : vector<10x32xf32> to vector<10xf32>
    %310 = vector.shape_cast %309 : vector<10xf32> to vector<10x1xf32>
    %cst_133 = arith.constant 3.200000e+01 : f32
    %311 = vector.broadcast %cst_133 : f32 to vector<10x1xf32>
    %312 = arith.divf %310, %311 : vector<10x1xf32>
    %cst_134 = arith.constant 9.99999997E-7 : f32
    %313 = vector.broadcast %cst_134 : f32 to vector<10x1xf32>
    %314 = arith.addf %312, %313 : vector<10x1xf32>
    %315 = math.rsqrt %314 : vector<10x1xf32>
    %316 = vector.broadcast %315 : vector<10x1xf32> to vector<10x32xf32>
    %317 = arith.mulf %307, %316 : vector<10x32xf32>
    %c0_135 = arith.constant 0 : index
    %c0_136 = arith.constant 0 : index
    %318 = vector.load %arg13[%c0_135, %c0_136] : memref<1x32xf32, #tpu.memory_space<vmem>>, vector<1x32xf32>
    %319 = vector.broadcast %318 : vector<1x32xf32> to vector<10x32xf32>
    %320 = arith.mulf %317, %319 : vector<10x32xf32>
    %c0_137 = arith.constant 0 : index
    %c0_138 = arith.constant 0 : index
    %321 = vector.load %arg14[%c0_137, %c0_138] : memref<1x32xf32, #tpu.memory_space<vmem>>, vector<1x32xf32>
    %322 = vector.broadcast %321 : vector<1x32xf32> to vector<10x32xf32>
    %323 = arith.addf %320, %322 : vector<10x32xf32>
    %324 = vector.extract_strided_slice %323 {offsets = [1, 0], sizes = [4, 32], strides = [1, 1]} : vector<10x32xf32> to vector<4x32xf32>
    %325 = vector.extract_strided_slice %323 {offsets = [6, 0], sizes = [4, 32], strides = [1, 1]} : vector<10x32xf32> to vector<4x32xf32>
    %326 = tpu.concatenate %324, %325 in 0 : vector<4x32xf32>, vector<4x32xf32> -> vector<8x32xf32>
    %c0_139 = arith.constant 0 : index
    %c0_140 = arith.constant 0 : index
    %327 = vector.load %arg17[%c0_139, %c0_140] : memref<8x32xf32, #tpu.memory_space<vmem>>, vector<8x32xf32>
    tpu.vector_store %arg17[%c0_139, %c0_140], %326 {strides = array<i32>} : memref<8x32xf32, #tpu.memory_space<vmem>>, vector<8x32xf32>,
    %328 = arith.truncf %326 : vector<8x32xf32> to vector<8x32xbf16>
    %c0_141 = arith.constant 0 : index
    %c0_142 = arith.constant 0 : index
    %329 = vector.load %arg15[%c0_141, %c0_142] : memref<32x128xbf16, #tpu.memory_space<vmem>>, vector<32x128xbf16>
    %cst_143 = arith.constant dense<0.000000e+00> : vector<8x128xf32>
    %330 = tpu.matmul %328, %329, %cst_143 {dimension_numbers = #tpu.dot_dimension_numbers<[1], [0], [0], [1], [0, 0, 1, 1], [], []>} : vector<8x32xbf16>, vector<32x128xbf16>, vector<8x128xf32> -> vector<8x128xf32>
    %c0_144 = arith.constant 0 : index
    %c0_145 = arith.constant 0 : index
    %331 = vector.load %arg16[%c0_144, %c0_145] : memref<1x128xf32, #tpu.memory_space<vmem>>, vector<1x128xf32>
    %332 = vector.broadcast %331 : vector<1x128xf32> to vector<8x128xf32>
    %333 = arith.addf %330, %332 : vector<8x128xf32>
    %c0_146 = arith.constant 0 : index
    %c0_147 = arith.constant 0 : index
    %334 = vector.load %arg18[%c0_146, %c0_147] : memref<8x128xf32, #tpu.memory_space<vmem>>, vector<8x128xf32>
    tpu.vector_store %arg18[%c0_146, %c0_147], %333 {strides = array<i32>} : memref<8x128xf32, #tpu.memory_space<vmem>>, vector<8x128xf32>,
    return
  }
  func.func @transform_0(%arg0: i32) -> (i32, i32) {
    %c0_i32 = arith.constant 0 : i32
    %c0_i32_0 = arith.constant 0 : i32
    %c0_i32_1 = arith.constant 0 : i32
    return %c0_i32, %c0_i32_0 : i32, i32
  }
  func.func @transform_1(%arg0: i32) -> (i32, i32) {
    %c0_i32 = arith.constant 0 : i32
    %c0_i32_0 = arith.constant 0 : i32
    %c0_i32_1 = arith.constant 0 : i32
    return %c0_i32, %c0_i32_0 : i32, i32
  }
  func.func @transform_2(%arg0: i32) -> (i32, i32) {
    %c0_i32 = arith.constant 0 : i32
    %c0_i32_0 = arith.constant 0 : i32
    %c0_i32_1 = arith.constant 0 : i32
    return %c0_i32, %c0_i32_0 : i32, i32
  }
  func.func @transform_3(%arg0: i32) -> (i32, i32) {
    %c0_i32 = arith.constant 0 : i32
    %c0_i32_0 = arith.constant 0 : i32
    %c0_i32_1 = arith.constant 0 : i32
    return %c0_i32, %c0_i32_0 : i32, i32
  }
  func.func @transform_4(%arg0: i32) -> (i32, i32, i32) {
    %c0_i32 = arith.constant 0 : i32
    %c0_i32_0 = arith.constant 0 : i32
    %c0_i32_1 = arith.constant 0 : i32
    %c0_i32_2 = arith.constant 0 : i32
    return %c0_i32, %c0_i32_0, %c0_i32_1 : i32, i32, i32
  }
  func.func @transform_5(%arg0: i32) -> (i32, i32, i32) {
    %c0_i32 = arith.constant 0 : i32
    %c0_i32_0 = arith.constant 0 : i32
    %c0_i32_1 = arith.constant 0 : i32
    %c0_i32_2 = arith.constant 0 : i32
    return %c0_i32, %c0_i32_0, %c0_i32_1 : i32, i32, i32
  }
  func.func @transform_6(%arg0: i32) -> (i32, i32, i32) {
    %c0_i32 = arith.constant 0 : i32
    %c0_i32_0 = arith.constant 0 : i32
    %c0_i32_1 = arith.constant 0 : i32
    %c0_i32_2 = arith.constant 0 : i32
    return %c0_i32, %c0_i32_0, %c0_i32_1 : i32, i32, i32
  }
  func.func @transform_7(%arg0: i32) -> (i32, i32, i32) {
    %c0_i32 = arith.constant 0 : i32
    %c0_i32_0 = arith.constant 0 : i32
    %c0_i32_1 = arith.constant 0 : i32
    %c0_i32_2 = arith.constant 0 : i32
    return %c0_i32, %c0_i32_0, %c0_i32_1 : i32, i32, i32
  }
  func.func @transform_8(%arg0: i32) -> (i32, i32, i32) {
    %c0_i32 = arith.constant 0 : i32
    %c0_i32_0 = arith.constant 0 : i32
    %c0_i32_1 = arith.constant 0 : i32
    %c0_i32_2 = arith.constant 0 : i32
    return %c0_i32, %c0_i32_0, %c0_i32_1 : i32, i32, i32
  }
  func.func @transform_9(%arg0: i32) -> (i32, i32, i32) {
    %c0_i32 = arith.constant 0 : i32
    %c0_i32_0 = arith.constant 0 : i32
    %c0_i32_1 = arith.constant 0 : i32
    %c0_i32_2 = arith.constant 0 : i32
    return %c0_i32, %c0_i32_0, %c0_i32_1 : i32, i32, i32
  }
  func.func @transform_10(%arg0: i32) -> (i32, i32, i32) {
    %c0_i32 = arith.constant 0 : i32
    %c0_i32_0 = arith.constant 0 : i32
    %c0_i32_1 = arith.constant 0 : i32
    %c0_i32_2 = arith.constant 0 : i32
    return %c0_i32, %c0_i32_0, %c0_i32_1 : i32, i32, i32
  }
  func.func @transform_11(%arg0: i32) -> (i32, i32, i32) {
    %c0_i32 = arith.constant 0 : i32
    %c0_i32_0 = arith.constant 0 : i32
    %c0_i32_1 = arith.constant 0 : i32
    %c0_i32_2 = arith.constant 0 : i32
    return %c0_i32, %c0_i32_0, %c0_i32_1 : i32, i32, i32
  }
  func.func @transform_12(%arg0: i32) -> (i32, i32) {
    %c0_i32 = arith.constant 0 : i32
    %c0_i32_0 = arith.constant 0 : i32
    %c0_i32_1 = arith.constant 0 : i32
    return %c0_i32, %c0_i32_0 : i32, i32
  }
  func.func @transform_13(%arg0: i32) -> (i32, i32) {
    %c0_i32 = arith.constant 0 : i32
    %c0_i32_0 = arith.constant 0 : i32
    %c0_i32_1 = arith.constant 0 : i32
    return %c0_i32, %c0_i32_0 : i32, i32
  }
  func.func @transform_14(%arg0: i32) -> (i32, i32) {
    %c0_i32 = arith.constant 0 : i32
    %c0_i32_0 = arith.constant 0 : i32
    %c0_i32_1 = arith.constant 0 : i32
    return %c0_i32, %c0_i32_0 : i32, i32
  }
  func.func @transform_15(%arg0: i32) -> (i32, i32) {
    %c0_i32 = arith.constant 0 : i32
    %c0_i32_0 = arith.constant 0 : i32
    %c0_i32_1 = arith.constant 0 : i32
    return %c0_i32, %c0_i32_0 : i32, i32
  }
  func.func @transform_16(%arg0: i32) -> (i32, i32) {
    %c0_i32 = arith.constant 0 : i32
    %c0_i32_0 = arith.constant 0 : i32
    %c0_i32_1 = arith.constant 0 : i32
    return %c0_i32, %c0_i32_0 : i32, i32
  }
  func.func @transform_17(%arg0: i32) -> (i32, i32) {
    %c0_i32 = arith.constant 0 : i32
    %c0_i32_0 = arith.constant 0 : i32
    %c0_i32_1 = arith.constant 0 : i32
    return %c0_i32, %c0_i32_0 : i32, i32
  }
}

</mosaic_0001>

<bundles_post_ra>
// kernel: eq.8
= control target key start
LH: loop header
LB: loop body
LE: loop exit
PB: predicated region body
PF: predicated region fallthrough
CT: control target
= control target key end

     0   :  { %vm7_vm0 = vcmask 39936   ;;  %vm13_vm1 = vcmask 80936   ;;  %s39_s0 = inlined_call_operand.vmem [shape: s32[2,5], index: 0, kind: input, shape index: {}]   ;;  %s40_s1 = inlined_call_operand.vmem [shape: s32[10], index: 1, kind: output, shape index: {}]  }
   0x1   :  { %v4_v0 = vld [vmem:[%s39_s0] sm:$0x3]  ;;  %s22_s0 = smov 5  }
   0x2   :  { %5 = vst [vmem:[#allocation1] sm:$0x3] %v4_v0 }
   0x9   :  { %v10_v1 = vld [vmem:[#allocation1 + $0x1] sm:$0x1]   ;;  %v6_v2 = vld [vmem:[#allocation1] sm:$0x1]  }
   0xa   :  { %11 = vrot.lane.b32.xlu0 %v10_v1, %s22_s0  ;;  %8 = vst.msk [vmem:[#allocation0] sm:$0x1] %vm7_vm0, %v6_v2  }
  0x7c   :  { %v12_v3 = vpop.permute.xlu0 %11  }
  0x7d   :  { %14 = vst.msk [vmem:[#allocation0] sm:$0x1] %vm13_vm1, %v12_v3  }
  0x84   :  { %v18_v4 = vld [vmem:[#allocation0] sm:$0x1] }
  0x85   :  { %20 = vst [vmem:[%s40_s1] sm:$0x1] %v18_v4 }

// kernel: tile.9
= control target key start
LH: loop header
LB: loop body
LE: loop exit
PB: predicated region body
PF: predicated region fallthrough
CT: control target
= control target key end

     0   :  { %vm3_vm0 = vcmask 261120   ;;  %s34_s0 = inlined_call_operand.vmem [shape: f32[2,5,32], index: 0, kind: input, shape index: {}]   ;;  %s35_s1 = inlined_call_operand.vmem [shape: f32[10,32], index: 1, kind: output, shape index: {}]  }
   0x1   :  { %v2_v0 = vld [vmem:[%s34_s0] sm:$0x1f]   ;;  %v10_v1 = vld [vmem:[%s34_s0 + $0x8] sm:$0x1f]  }
   0x2   :  { %4 = vst.msk [vmem:[%s35_s1] sm:$0x1f] %vm3_vm0, %v2_v0   ;;  %11 = vst.msk [vmem:[%s35_s1 + $0x5] sm:$0x1f] %vm3_vm0, %v10_v1  }

// kernel: encoder2d_forward.1
= control target key start
LH: loop header
LB: loop body
LE: loop exit
PB: predicated region body
PF: predicated region fallthrough
CT: control target
= control target key end

     0   :  { %s4394_s0 = inlined_call_operand.vmem [shape: bf16[10,192], index: 0, kind: input, shape index: {}]   ;;  %s4395_s1 = inlined_call_operand.vmem [shape: f32[10,32], index: 1, kind: input, shape index: {}]   ;;  %s4396_s2 = inlined_call_operand.vmem [shape: f32[10,10], index: 2, kind: input, shape index: {}]   ;;  %s4397_s3 = inlined_call_operand.vmem [shape: bf16[192,32], index: 3, kind: input, shape index: {}]   ;;  %s4398_s4 = inlined_call_operand.vmem [shape: bf16[2,32,96], index: 4, kind: input, shape index: {}]   ;;  %s4399_s5 = inlined_call_operand.vmem [shape: f32[2,1,96], index: 5, kind: input, shape index: {}]   ;;  %s4400_s6 = inlined_call_operand.vmem [shape: bf16[2,32,32], index: 6, kind: input, shape index: {}]   ;;  %s4401_s7 = inlined_call_operand.vmem [shape: f32[2,1,32], index: 7, kind: input, shape index: {}]   ;;  %s4402_s8 = inlined_call_operand.vmem [shape: bf16[2,32,128], index: 8, kind: input, shape index: {}]   ;;  %s4403_s9 = inlined_call_operand.vmem [shape: f32[2,1,128], index: 9, kind: input, shape index: {}]   ;;  %s4404_s10 = inlined_call_operand.vmem [shape: bf16[2,128,32], index: 10, kind: input, shape index: {}]   ;;  %s4405_s11 = inlined_call_operand.vmem [shape: f32[2,1,32], index: 11, kind: input, shape index: {}]   ;;  %s4406_s12 = inlined_call_operand.vmem [shape: f32[1,32], index: 12, kind: input, shape index: {}]   ;;  %s4407_s13 = inlined_call_operand.vmem [shape: f32[1,32], index: 13, kind: input, shape index: {}]   ;;  %s4408_s14 = inlined_call_operand.vmem [shape: bf16[32,128], index: 14, kind: input, shape index: {}]   ;;  %s4409_s15 = inlined_call_operand.vmem [shape: f32[1,128], index: 15, kind: input, shape index: {}]   ;;  %s4410_s16 = inlined_call_operand.hbm [shape: f32[8,32], index: 16, kind: output, shape index: {0}]   ;;  %s4411_s17 = inlined_call_operand.vmem [shape: f32[8,128], index: 17, kind: output, shape index: {1}]  }
   0x1   :  { %4421 = sst [smem:[#allocation5_spill]] %s4394_s0 }
   0x2   :  { %4422 = sst [smem:[#allocation6_spill]] %s4395_s1 }
   0x3   :  { %v3537_v0 = vld [vmem:[%s4397_s3] sm:$0xff]   ;;  %v3700_v1 = vmov 0   ;;  %v3538_v2 = vld [vmem:[%s4397_s3 + $0x8] sm:$0xff]   ;;  %v3539_v3 = vld [vmem:[%s4397_s3 + $0x10] sm:$0xff]   ;;  %vm168_vm0 = vcmask 523264   ;;  %s4423_s21 = sld [smem:[#allocation5_spill]] }
   0x4   :  { %172 = vmatprep.subr.bf16.mxu0 %v3700_v1  ;;  %v3540_v4 = vld [vmem:[%s4397_s3 + $0x18] sm:$0xff]   ;;  %v3541_v5 = vld [vmem:[%s4397_s3 + $0x20] sm:$0xff]   ;;  %v3542_v7 = vld [vmem:[%s4397_s3 + $0x28] sm:$0xff]  }
   0x5   :  { %173 = vmatpush1.bf16.msra.mxu0 %v3537_v0  ;;  %v3543_v8 = vld [vmem:[%s4397_s3 + $0x30] sm:$0xff]   ;;  %v3544_v9 = vld [vmem:[%s4397_s3 + $0x38] sm:$0xff]   ;;  %v3545_v10 = vld [vmem:[%s4397_s3 + $0x40] sm:$0xff]  }
   0x6   :  { %174 = vmatprep.subr.bf16.mxu0 %v3700_v1 }
   0x9   :  { %175 = vmatpush1.bf16.msra.mxu0 %v3538_v2  ;;  %v3551_v6 = vld [vmem:[%s4423_s21 + $0x4] ss:$8 sps:$4 sm:$0x1f]  }
   0xa   :  { %176 = vmatprep.subr.bf16.mxu0 %v3700_v1  ;;  %2864 = vmatprep.mubr.msk.bf16.mxu0 %vm168_vm0, %v3551_v6 }
   0xd   :  { %177 = vmatpush1.bf16.msra.mxu0 %v3539_v3 }
   0xe   :  { %178 = vmatprep.subr.bf16.mxu0 %v3700_v1 }
  0x11   :  { %179 = vmatpush1.bf16.msra.mxu0 %v3540_v4 }
  0x12   :  { %180 = vmatprep.subr.bf16.mxu0 %v3700_v1 }
  0x15   :  { %181 = vmatpush1.bf16.msra.mxu0 %v3541_v5 }
  0x16   :  { %182 = vmatprep.subr.bf16.mxu0 %v3700_v1 }
  0x19   :  { %183 = vmatpush1.bf16.msra.mxu0 %v3542_v7 }
  0x1a   :  { %184 = vmatprep.subr.bf16.mxu0 %v3700_v1 }
  0x1d   :  { %185 = vmatpush1.bf16.msra.mxu0 %v3543_v8 }
  0x1e   :  { %186 = vmatprep.subr.bf16.mxu0 %v3700_v1 }
  0x21   :  { %187 = vmatpush1.bf16.msra.mxu0 %v3544_v9 }
  0x22   :  { %188 = vmatprep.subr.bf16.mxu0 %v3700_v1 }
  0x23   :  { %23 = vsyncpa [#allocation3], 0  ;;  %v3546_v11 = vld [vmem:[%s4397_s3 + $0x48] sm:$0xff]   ;;  %v3547_v12 = vld [vmem:[%s4397_s3 + $0x50] sm:$0xff]   ;;  %s4424_s26 = sld [smem:[#allocation6_spill]]  ;;  %vm213_vm1 = vcmask 261120  }
  0x24   :  { %v3548_v13 = vld [vmem:[%s4397_s3 + $0x58] sm:$0xff]   ;;  %v3549_v14 = vld [vmem:[%s4423_s21] ss:$8 sps:$4 sm:$0x1f]   ;;  %vm217_vm2 = vcmask 254976   ;;  %v3701_v36 = vmov 0.0  }
  0x25   :  { %189 = vmatpush1.bf16.msra.mxu0 %v3545_v10  ;;  %v3552_v35 = vld [vmem:[%s4398_s4] sm:$0xff]   ;;  %v3553_v37 = vld [vmem:[%s4398_s4 + $0x8] sm:$0xff]   ;;  %vm3702_vm3 = vmmov 0   ;;  %vm316_vm4 = vcmask 64512   ;;  %s3703_s19 = smov 96   ;;  %s3704_s1 = smov 88  }
  0x26   :  { %190 = vmatprep.subr.bf16.mxu0 %v3700_v1  ;;  %v2865_v49 = vld [vmem:[%s4399_s5] ss:$0 sm:$0xff]  ;;  %s3705_s20 = smov 120   ;;  %vm3903_vm5 = vmpackc.low %vm316_vm4, %vm316_vm4  ;;  %vm404_vm6 = vcmask 80896   ;;  %v3921_v3 = vld [vmem:[%s4396_s2 + $0x8] sm:$0x3] }
  0x27   :  { %v3916_v0 = vld [vmem:[%s4396_s2] sm:$0xff]  ;;  %vm408_vm7 = vcmask 74752   ;;  %vm439_vm8 = vcmask 1041408   ;;  %vm3707_vm9 = vmmov 1   ;;  %s3708_s27 = smov 56   ;;  %s3709_s28 = smov 112  }
  0x28   :  { %vm3931_vm10 = vmpackc.low %vm439_vm8, %vm3707_vm9  ;;  %s3710_s3 = smov 80   ;;  %s3711_s21 = smov 48   ;;  %vm1158_vm11 = vcmask 130048   ;;  %vm1161_vm12 = vcmask 195584   ;;  %v3674_v60 = vld [vmem:[%s4396_s2 + $0x8] sm:$0x3] }
  0x29   :  { %191 = vmatpush1.bf16.msra.mxu0 %v3546_v11  ;;  %v85_v15 = vld [vmem:[%s4424_s26] sm:$0xff]  ;;  %v86_v17 = vld [vmem:[%s4424_s26 + $0x8] sm:$0x3]  ;;  %s3706_s26 = smov 64   ;;  %s4418_s29 = smov 104   ;;  %vm2756_vm13 = vcmask 1045504  }
  0x2a   :  { %192 = vmatprep.subr.bf16.mxu0 %v3700_v1  ;;  %s4420_s0 = smov 72   ;;  %s4414_s30 = smov 40   ;;  %vm2761_vm14 = vcmask 1043456  }
  0x2b   :  { %s4415_s18 = smov 16   ;;  %s4417_s22 = smov 8  }
  0x2d   :  { %193 = vmatpush1.bf16.msra.mxu0 %v3547_v12 }
  0x2e   :  { %194 = vmatprep.subr.bf16.mxu0 %v3700_v1 }
  0x31   :  { %195 = vmatpush1.bf16.msra.mxu0 %v3548_v13 }
  0x32   :  { %3104 = vmatprep.subr.bf16.mxu0 %v3701_v36 }
  0x34   :  { %205 = vmatmul.mubr.bf16.vlgmr.msra.gmra.mrb[0].mxu0 %v3549_v14 }
  0x35   :  { %3105 = vmatpush3.bf16.msra.mxu0 %v3552_v35  ;;  %3108 = vmatprep.mubr.msk.bf16.mxu0 %vm3702_vm3, %v3701_v36 }
  0x36   :  { %3106 = vmatprep.subr.bf16.mxu0 %v3701_v36 }
  0x39   :  { %3107 = vmatpush3.bf16.msra.mxu0 %v3553_v37 }
 0x107   :  { %v206_v16 = vpop.f32.mrb[0].mxu0 }
 0x108   :  { %v3857_v18 = vadd.f32 %v206_v16, %v85_v15  ;;  %v208_v19 = vpop.f32.mrb[1].mxu0 }
 0x109   :  { %v209_v20 = vpop.f32.mrb[2].mxu0 }
 0x10a   :  { %v3859_v21 = vadd.f32 %v209_v20, %v86_v17  ;;  %v211_v22 = vpop.f32.mrb[3].mxu0  ;;  %v214_v23 = vsel %vm213_vm1, %v3857_v18, 0.0 }
 0x10b   :  { %215 = vadd.xlane.f32.xlu0 %v214_v23 }
 0x10c   :  { %v218_v24 = vsel %vm217_vm2, %v3859_v21, 0.0 }
 0x10f   :  { %219 = vadd.xlane.f32.xlu0 %v218_v24 }
 0x198   :  { %v216_v25 = vpop.xlane.xlu0 %215 }
 0x199   :  { %v222_v26 = vmul.f32 0.03125, %v216_v25 }
 0x19b   :  { %v224_v27 = vsub.f32 %v3857_v18, %v222_v26 }
 0x19c   :  { %v220_v28 = vpop.xlane.xlu0 %219 }
 0x19d   :  { %v223_v29 = vmul.f32 0.03125, %v220_v28  ;;  %v226_v30 = vmul.f32 %v224_v27, %v224_v27  ;;  %v3569_v28 = vld [vmem:[%s4400_s6 + $0x18] sm:$0xff]  }
 0x19f   :  { %v225_v31 = vsub.f32 %v3859_v21, %v223_v29  ;;  %v228_v32 = vsel %vm213_vm1, %v226_v30, 0.0 }
 0x1a0   :  { %229 = vadd.xlane.f32.xlu1 %v228_v32 }
 0x1a1   :  { %v227_v33 = vmul.f32 %v225_v31, %v225_v31 }
 0x1a3   :  { %v231_v34 = vsel %vm217_vm2, %v227_v33, 0.0 }
 0x1a4   :  { %232 = vadd.xlane.f32.xlu1 %v231_v34 }
 0x22d   :  { %v230_v38 = vpop.xlane.xlu1 %229 }
 0x22e   :  { %v234_v39 = vmul.f32 0.03125, %v230_v38 }
 0x230   :  { %v236_v40 = vadd.f32 1e-06, %v234_v39 }
 0x231   :  { %v233_v41 = vpop.xlane.xlu1 %232 }
 0x232   :  { %v235_v42 = vmul.f32 0.03125, %v233_v41  ;;  %3582 = vrsqrt.f32 %v236_v40 }
 0x234   :  { %v237_v43 = vadd.f32 1e-06, %v235_v42 }
 0x236   :  { %3584 = vrsqrt.f32 %v237_v43 }
 0x23c   :  { %v3583_v44 = vpop.eup %3582 }
 0x23d   :  { %v240_v46 = vmul.f32 %v3583_v44, %v224_v27 }
 0x240   :  { %v3585_v45 = vpop.eup %3584 }
 0x241   :  { %v241_v47 = vmul.f32 %v3585_v45, %v225_v31 }
 0x243   :  { %v242_v48 = vpack.c.bf16 %v241_v47, %v240_v46 }
 0x245   :  { %3109 = vmatmul.mubr.msk.bf16.vlgmr.msra.gmra.mrb[4].mxu0 %vm213_vm1, %v242_v48 }
 0x318   :  { %v303_v50 = vpop.f32.mrb[4].mxu0 }
 0x319   :  { %v3883_v51 = vadd.f32 %v2865_v49, %v303_v50  ;;  %v3110_v52 = vpop.f32.mrb[5].mxu0 }
 0x31a   :  { %v306_v53 = vpop.f32.mrb[6].mxu0 }
 0x31b   :  { %v3885_v54 = vadd.f32 %v2865_v49, %v306_v53  ;;  %v3111_v55 = vpop.f32.mrb[7].mxu0  ;;  %3116 = vmatprep.mubr.msk.f32.mxu1 %vm316_vm4, %v3883_v51 }
 0x31d   :  { %v3891_v56 = vpack.i.bf16 %v3885_v54, %v3883_v51 }
 0x31f   :  { %3428 = vrot.lane.b32.xlu0 %v3891_v56, %s3703_s19 }
 0x323   :  { %3438 = vrot.lane.b32.xlu0 %v3891_v56, %s3704_s1 }
 0x327   :  { %517 = vrot.lane.b32.xlu0 %v3883_v51, %s3705_s20 }
 0x32b   :  { %519 = vrot.lane.b32.xlu0 %v3885_v54, %s3705_s20 }
 0x391   :  { %v3429_v57 = vpop.permute.xlu0 %3428 }
 0x392   :  { %v3431_v58 = vunpack.i.h.bf16 %v3429_v57  ;;  %v3430_v59 = vunpack.i.l.bf16 %v3429_v57 }
 0x394   :  { %v3312_v61 = vpack.c.bf16 %v3431_v58, %v3430_v59 }
 0x395   :  { %v3439_v22 = vpop.permute.xlu0 %3438 }
 0x396   :  { %3314 = vmatprep.subr.msk.bf16.mxu1 %vm3903_vm5, %v3312_v61  ;;  %v3441_v24 = vunpack.i.h.bf16 %v3439_v22  ;;  %v3440_v25 = vunpack.i.l.bf16 %v3439_v22 }
 0x397   :  { %3317 = vmatpush3.bf16.xpose.msk.msra.mxu1 %vm3903_vm5, %v3312_v61 }
 0x398   :  { %v3324_v30 = vpack.c.bf16 %v3441_v24, %v3440_v25 }
 0x399   :  { %v518_v35 = vpop.permute.xlu0 %517 }
 0x39d   :  { %v520_v37 = vpop.permute.xlu0 %519 }
 0x39e   :  { %3117 = vmatmul.mubr.msk.f32.vlgmr.msra.gmra.mrb[0].mxu1 %vm316_vm4, %v3885_v54 }
 0x471   :  { %v3118_v62 = vpop.f32.mrb[0].mxu1 }
 0x472   :  { %v391_v63 = vpop.f32.mrb[1].mxu1  ;;  %v401_v1 = vmul.f32 0.35355338, %v3118_v62 }
 0x473   :  { %v400_v2 = vmul.f32 0.35355338, %v391_v63 }
 0x474   :  { %v403_v6 = vadd.f32 %v401_v1, %v3921_v3 }
 0x475   :  { %v402_v4 = vadd.f32 %v400_v2, %v3916_v0 }
 0x476   :  { %v409_v7 = vsel %vm408_vm7, %v403_v6, -inf }
 0x477   :  { %v405_v5 = vsel %vm404_vm6, %v402_v4, -inf }
 0x478   :  { %406 = vmax.xlane.f32.xlu1 %v405_v5 }
 0x47c   :  { %410 = vmax.xlane.f32.xlu1 %v409_v7 }
 0x505   :  { %v407_v8 = vpop.xlane.xlu1 %406 }
 0x506   :  { %v412_v9 = vsub.f32 %v402_v4, %v407_v8 }
 0x508   :  { %v414_v12 = vmul.f32 1.442695, %v412_v9 }
 0x509   :  { %v411_v10 = vpop.xlane.xlu1 %410 }
 0x50a   :  { %v413_v11 = vsub.f32 %v403_v6, %v411_v10 }
 0x50c   :  { %v416_v13 = vmul.f32 1.442695, %v413_v11 }
 0x50e   :  { %3586 = vpow2.f32 %v416_v13 }
 0x50f   :  { %3588 = vpow2.f32 %v414_v12 }
 0x518   :  { %v3587_v14 = vpop.eup %3586 }
 0x519   :  { %v421_v15 = vsel %vm408_vm7, %v3587_v14, 0.0  ;;  %v3589_v16 = vpop.eup %3588 }
 0x51a   :  { %422 = vadd.xlane.f32.xlu1 %v421_v15  ;;  %v418_v17 = vsel %vm404_vm6, %v3589_v16, 0.0 }
 0x51e   :  { %419 = vadd.xlane.f32.xlu1 %v418_v17 }
 0x52f   :  { %3433 = vrot.lane.b32.xlu1 %v3891_v56, %s3706_s26 }
 0x5a7   :  { %v423_v19 = vpop.xlane.xlu1 %422 }
 0x5a8   :  { %3590 = vrcp.f32 %v423_v19 }
 0x5ab   :  { %v420_v20 = vpop.xlane.xlu1 %419 }
 0x5ac   :  { %3592 = vrcp.f32 %v420_v20 }
 0x5af   :  { %v3434_v23 = vpop.permute.xlu1 %3433 }
 0x5b0   :  { %v3436_v26 = vunpack.i.h.bf16 %v3434_v23  ;;  %v3435_v27 = vunpack.i.l.bf16 %v3434_v23 }
 0x5b2   :  { %v3318_v29 = vpack.c.bf16 %v3436_v26, %v3435_v27  ;;  %v3591_v31 = vpop.eup %3590 }
 0x5b3   :  { %v427_v34 = vmul.f32 %v3591_v31, %v3587_v14 }
 0x5b4   :  { %3320 = vmatprep.subr.msk.bf16.mxu1 %vm3931_vm10, %v3318_v29 }
 0x5b5   :  { %3323 = vmatpush3.bf16.msk.msra.mxu1 %vm3931_vm10, %v3318_v29 }
 0x5b6   :  { %v3593_v32 = vpop.eup %3592  ;;  %3326 = vmatprep.subr.msk.bf16.mxu1 %vm3903_vm5, %v3324_v30 }
 0x5b7   :  { %v425_v33 = vmul.f32 %v3593_v32, %v3589_v16 }
 0x5b9   :  { %3123 = vmatprep.mubr.msk.f32.mxu1 %vm404_vm6, %v425_v33 }
 0x5ba   :  { %3124 = vmatmul.mubr.msk.f32.vlgmr.msra.gmra.mrb[2].mxu1 %vm404_vm6, %v427_v34 }
 0x5bb   :  { %3130 = vmatprep.mubr.msk.f32.mxu1 %vm316_vm4, %v518_v35 }
 0x5be   :  { %3329 = vmatpush3.bf16.xpose.msk.msra.mxu1 %vm3903_vm5, %v3324_v30 }
 0x5c5   :  { %3131 = vmatmul.mubr.msk.f32.vlgmr.msra.gmra.mrb[4].mxu1 %vm316_vm4, %v520_v37 }
 0x68d   :  { %v3947_v38 = vpop.f32.mrb[2].mxu1 }
 0x68e   :  { %v3949_v39 = vpop.f32.mrb[3].mxu1 }
 0x698   :  { %v3132_v40 = vpop.f32.mrb[4].mxu1 }
 0x699   :  { %v609_v41 = vmul.f32 0.35355338, %v3132_v40  ;;  %v599_v42 = vpop.f32.mrb[5].mxu1 }
 0x69a   :  { %v608_v43 = vmul.f32 0.35355338, %v599_v42 }
 0x69b   :  { %v611_v44 = vadd.f32 %v609_v41, %v3921_v3 }
 0x69c   :  { %v610_v45 = vadd.f32 %v608_v43, %v3916_v0 }
 0x69d   :  { %v615_v46 = vsel %vm408_vm7, %v611_v44, -inf }
 0x69e   :  { %616 = vmax.xlane.f32.xlu0 %v615_v46  ;;  %v612_v47 = vsel %vm404_vm6, %v610_v45, -inf }
 0x69f   :  { %613 = vmax.xlane.f32.xlu1 %v612_v47 }
 0x6b0   :  { %3443 = vrot.lane.b32.xlu1 %v3891_v56, %s3708_s27 }
 0x6b4   :  { %722 = vrot.lane.b32.xlu1 %v3883_v51, %s3709_s28 }
 0x6b8   :  { %724 = vrot.lane.b32.xlu1 %v3885_v54, %s3709_s28 }
 0x72b   :  { %v617_v48 = vpop.xlane.xlu0 %616 }
 0x72c   :  { %v619_v49 = vsub.f32 %v611_v44, %v617_v48  ;;  %v614_v50 = vpop.xlane.xlu1 %613 }
 0x72d   :  { %v618_v52 = vsub.f32 %v610_v45, %v614_v50 }
 0x72e   :  { %v622_v53 = vmul.f32 1.442695, %v619_v49 }
 0x72f   :  { %v620_v55 = vmul.f32 1.442695, %v618_v52 }
 0x730   :  { %3594 = vpow2.f32 %v622_v53  ;;  %v3444_v57 = vpop.permute.xlu1 %3443 }
 0x731   :  { %v3446_v58 = vunpack.i.h.bf16 %v3444_v57  ;;  %v3445_v59 = vunpack.i.l.bf16 %v3444_v57  ;;  %3596 = vpow2.f32 %v620_v55 }
 0x733   :  { %v3330_v61 = vpack.c.bf16 %v3446_v58, %v3445_v59 }
 0x734   :  { %v723_v14 = vpop.permute.xlu1 %722 }
 0x735   :  { %3332 = vmatprep.subr.msk.bf16.mxu1 %vm3931_vm10, %v3330_v61 }
 0x736   :  { %3335 = vmatpush3.bf16.msk.msra.mxu1 %vm3931_vm10, %v3330_v61 }
 0x738   :  { %v725_v15 = vpop.permute.xlu1 %724 }
 0x73a   :  { %v3595_v62 = vpop.eup %3594 }
 0x73b   :  { %v627_v63 = vsel %vm408_vm7, %v3595_v62, 0.0  ;;  %v3597_v1 = vpop.eup %3596 }
 0x73c   :  { %628 = vadd.xlane.f32.xlu0 %v627_v63  ;;  %v624_v2 = vsel %vm404_vm6, %v3597_v1, 0.0 }
 0x740   :  { %625 = vadd.xlane.f32.xlu0 %v624_v2 }
 0x756   :  { %3448 = vrot.lane.b32.xlu0 %v3891_v56, %s3710_s3 }
 0x7c9   :  { %v629_v4 = vpop.xlane.xlu0 %628 }
 0x7ca   :  { %3598 = vrcp.f32 %v629_v4 }
 0x7cd   :  { %v626_v5 = vpop.xlane.xlu0 %625 }
 0x7ce   :  { %3600 = vrcp.f32 %v626_v5 }
 0x7d1   :  { %v3449_v6 = vpop.permute.xlu0 %3448 }
 0x7d2   :  { %v3451_v7 = vunpack.i.h.bf16 %v3449_v6  ;;  %v3450_v8 = vunpack.i.l.bf16 %v3449_v6 }
 0x7d4   :  { %v3336_v9 = vpack.c.bf16 %v3451_v7, %v3450_v8  ;;  %v3599_v10 = vpop.eup %3598 }
 0x7d5   :  { %v633_v13 = vmul.f32 %v3599_v10, %v3595_v62 }
 0x7d6   :  { %3338 = vmatprep.subr.msk.bf16.mxu1 %vm3903_vm5, %v3336_v9 }
 0x7d8   :  { %v3601_v11 = vpop.eup %3600 }
 0x7d9   :  { %v631_v12 = vmul.f32 %v3601_v11, %v3597_v1 }
 0x7db   :  { %3137 = vmatprep.mubr.msk.f32.mxu1 %vm404_vm6, %v631_v12 }
 0x7dc   :  { %3138 = vmatmul.mubr.msk.f32.vlgmr.msra.gmra.mrb[6].mxu1 %vm404_vm6, %v633_v13 }
 0x7dd   :  { %3341 = vmatpush3.bf16.xpose.msk.msra.mxu1 %vm3903_vm5, %v3336_v9  ;;  %3144 = vmatprep.mubr.msk.f32.mxu1 %vm316_vm4, %v723_v14 }
 0x7e4   :  { %3145 = vmatmul.mubr.msk.f32.vlgmr.msra.gmra.mrb[8].mxu1 %vm316_vm4, %v725_v15 }
 0x8af   :  { %v3977_v16 = vpop.f32.mrb[6].mxu1 }
 0x8b0   :  { %v3979_v17 = vpop.f32.mrb[7].mxu1 }
 0x8b1   :  { %v3467_v19 = vpack.i.bf16 %v3977_v16, %v3979_v17  ;;  %v3554_v16 = vld [vmem:[%s4400_s6] sm:$0xff]   ;;  %v3555_v17 = vld [vmem:[%s4400_s6 + $0x8] sm:$0xff]  }
 0x8b7   :  { %v3146_v20 = vpop.f32.mrb[8].mxu1 }
 0x8b8   :  { %v814_v22 = vmul.f32 0.35355338, %v3146_v20  ;;  %v804_v23 = vpop.f32.mrb[9].mxu1 }
 0x8b9   :  { %v813_v24 = vmul.f32 0.35355338, %v804_v23 }
 0x8ba   :  { %v816_v25 = vadd.f32 %v814_v22, %v3921_v3 }
 0x8bb   :  { %v815_v26 = vadd.f32 %v813_v24, %v3916_v0 }
 0x8bc   :  { %v820_v27 = vsel %vm408_vm7, %v816_v25, -inf }
 0x8bd   :  { %821 = vmax.xlane.f32.xlu0 %v820_v27  ;;  %v817_v29 = vsel %vm404_vm6, %v815_v26, -inf }
 0x8be   :  { %818 = vmax.xlane.f32.xlu1 %v817_v29 }
 0x8cf   :  { %3453 = vrot.lane.b32.xlu1 %v3891_v56, %s3711_s21 }
 0x8d3   :  { %927 = vrot.lane.b32.xlu1 %v3883_v51, %s4418_s29 }
 0x8d7   :  { %929 = vrot.lane.b32.xlu1 %v3885_v54, %s4418_s29 }
 0x94a   :  { %v822_v30 = vpop.xlane.xlu0 %821 }
 0x94b   :  { %v824_v31 = vsub.f32 %v816_v25, %v822_v30  ;;  %v819_v32 = vpop.xlane.xlu1 %818 }
 0x94c   :  { %v823_v33 = vsub.f32 %v815_v26, %v819_v32 }
 0x94d   :  { %v827_v34 = vmul.f32 1.442695, %v824_v31 }
 0x94e   :  { %v825_v35 = vmul.f32 1.442695, %v823_v33 }
 0x94f   :  { %3602 = vpow2.f32 %v827_v34  ;;  %v3454_v37 = vpop.permute.xlu1 %3453 }
 0x950   :  { %v3456_v40 = vunpack.i.h.bf16 %v3454_v37  ;;  %v3455_v41 = vunpack.i.l.bf16 %v3454_v37  ;;  %3604 = vpow2.f32 %v825_v35 }
 0x952   :  { %v3342_v42 = vpack.c.bf16 %v3456_v40, %v3455_v41 }
 0x953   :  { %v928_v58 = vpop.permute.xlu1 %927 }
 0x954   :  { %3344 = vmatprep.subr.msk.bf16.mxu1 %vm3931_vm10, %v3342_v42 }
 0x955   :  { %3347 = vmatpush3.bf16.msk.msra.mxu1 %vm3931_vm10, %v3342_v42 }
 0x957   :  { %v930_v59 = vpop.permute.xlu1 %929 }
 0x959   :  { %v3603_v51 = vpop.eup %3602 }
 0x95a   :  { %v832_v54 = vsel %vm408_vm7, %v3603_v51, 0.0  ;;  %v3605_v43 = vpop.eup %3604 }
 0x95b   :  { %833 = vadd.xlane.f32.xlu0 %v832_v54  ;;  %v829_v44 = vsel %vm404_vm6, %v3605_v43, 0.0 }
 0x95f   :  { %830 = vadd.xlane.f32.xlu0 %v829_v44 }
 0x975   :  { %3458 = vrot.lane.b32.xlu0 %v3891_v56, %s4420_s0 }
 0x9e8   :  { %v834_v45 = vpop.xlane.xlu0 %833 }
 0x9e9   :  { %3606 = vrcp.f32 %v834_v45 }
 0x9ec   :  { %v831_v46 = vpop.xlane.xlu0 %830 }
 0x9ed   :  { %3608 = vrcp.f32 %v831_v46 }
 0x9f0   :  { %v3459_v47 = vpop.permute.xlu0 %3458 }
 0x9f1   :  { %v3461_v48 = vunpack.i.h.bf16 %v3459_v47  ;;  %v3460_v49 = vunpack.i.l.bf16 %v3459_v47 }
 0x9f3   :  { %v3348_v50 = vpack.c.bf16 %v3461_v48, %v3460_v49  ;;  %v3607_v52 = vpop.eup %3606 }
 0x9f4   :  { %v838_v57 = vmul.f32 %v3607_v52, %v3603_v51 }
 0x9f5   :  { %3350 = vmatprep.subr.msk.bf16.mxu1 %vm3903_vm5, %v3348_v50 }
 0x9f7   :  { %v3609_v53 = vpop.eup %3608 }
 0x9f8   :  { %v836_v55 = vmul.f32 %v3609_v53, %v3605_v43 }
 0x9fa   :  { %3151 = vmatprep.mubr.msk.f32.mxu1 %vm404_vm6, %v836_v55 }
 0x9fb   :  { %3152 = vmatmul.mubr.msk.f32.vlgmr.msra.gmra.mrb[10].mxu1 %vm404_vm6, %v838_v57 }
 0x9fc   :  { %3353 = vmatpush3.bf16.xpose.msk.msra.mxu1 %vm3903_vm5, %v3348_v50  ;;  %3158 = vmatprep.mubr.msk.f32.mxu1 %vm316_vm4, %v928_v58 }
 0x9fd   :  { %3168 = vmatprep.subr.bf16.mxu1 %v3701_v36 }
 0xa03   :  { %3159 = vmatmul.mubr.msk.f32.vlgmr.msra.gmra.mrb[12].mxu1 %vm316_vm4, %v930_v59 }
 0xa04   :  { %3172 = vmatprep.mubr.msk.bf16.mxu1 %vm3702_vm3, %v3701_v36  ;;  %3169 = vmatpush3.bf16.msra.mxu1 %v3554_v16  ;;  %v3562_v16 = vld [vmem:[%s4404_s10 + $0x20] sm:$0xff]  }
 0xa05   :  { %3170 = vmatprep.subr.bf16.mxu1 %v3701_v36 }
 0xa08   :  { %3171 = vmatpush3.bf16.msra.mxu1 %v3555_v17  ;;  %v3563_v17 = vld [vmem:[%s4404_s10 + $0x28] sm:$0xff]  }
 0xa09   :  { %3184 = vmatprep.subr.bf16.mxu1 %v3701_v36 }
 0xace   :  { %v3153_v61 = vpop.f32.mrb[10].mxu1 }
 0xacf   :  { %v918_v62 = vpop.f32.mrb[11].mxu1 }
 0xad0   :  { %v3472_v63 = vpack.i.bf16 %v3153_v61, %v918_v62 }
 0xad6   :  { %v3160_v1 = vpop.f32.mrb[12].mxu1 }
 0xad7   :  { %v1019_v2 = vmul.f32 0.35355338, %v3160_v1  ;;  %v1009_v4 = vpop.f32.mrb[13].mxu1 }
 0xad8   :  { %v1018_v5 = vmul.f32 0.35355338, %v1009_v4 }
 0xad9   :  { %v1021_v6 = vadd.f32 %v1019_v2, %v3921_v3 }
 0xada   :  { %v1020_v7 = vadd.f32 %v1018_v5, %v3916_v0 }
 0xadb   :  { %v1025_v8 = vsel %vm408_vm7, %v1021_v6, -inf }
 0xadc   :  { %1026 = vmax.xlane.f32.xlu0 %v1025_v8  ;;  %v1022_v9 = vsel %vm404_vm6, %v1020_v7, -inf }
 0xadd   :  { %1023 = vmax.xlane.f32.xlu1 %v1022_v9 }
 0xaee   :  { %3463 = vrot.lane.b32.xlu1 %v3891_v56, %s4414_s30 }
 0xaf2   :  { %3473 = vrot.lane.b32.xlu1 %v3472_v63, %s4415_s18  ;;  %s4416_s18 = smov 24  }
 0xb69   :  { %v1027_v10 = vpop.xlane.xlu0 %1026 }
 0xb6a   :  { %v1029_v11 = vsub.f32 %v1021_v6, %v1027_v10  ;;  %v1024_v12 = vpop.xlane.xlu1 %1023 }
 0xb6b   :  { %v1028_v13 = vsub.f32 %v1020_v7, %v1024_v12 }
 0xb6c   :  { %v1032_v14 = vmul.f32 1.442695, %v1029_v11 }
 0xb6d   :  { %v1030_v15 = vmul.f32 1.442695, %v1028_v13  ;;  %v3556_v13 = vld [vmem:[%s4402_s8] sm:$0xff]  }
 0xb6e   :  { %v3464_v20 = vpop.permute.xlu1 %3463 }
 0xb6f   :  { %3610 = vpow2.f32 %v1030_v15  ;;  %v3466_v22 = vunpack.i.h.bf16 %v3464_v20  ;;  %v3465_v23 = vunpack.i.l.bf16 %v3464_v20 }
 0xb70   :  { %3612 = vpow2.f32 %v1032_v14  ;;  %v3557_v14 = vld [vmem:[%s4402_s8 + $0x8] sm:$0xff]  }
 0xb71   :  { %v3354_v24 = vpack.c.bf16 %v3466_v22, %v3465_v23 }
 0xb72   :  { %v3474_v51 = vpop.permute.xlu1 %3473 }
 0xb73   :  { %3356 = vmatprep.subr.msk.bf16.mxu0 %vm3931_vm10, %v3354_v24  ;;  %v3476_v44 = vunpack.i.h.bf16 %v3474_v51  ;;  %v3475_v45 = vunpack.i.l.bf16 %v3474_v51 }
 0xb74   :  { %3359 = vmatpush3.bf16.msk.msra.mxu0 %vm3931_vm10, %v3354_v24 }
 0xb75   :  { %3176 = vmatprep.subr.bf16.mxu0 %v3701_v36 }
 0xb79   :  { %v3611_v56 = vpop.eup %3610 }
 0xb7a   :  { %v1034_v25 = vsel %vm404_vm6, %v3611_v56, 0.0  ;;  %v3613_v26 = vpop.eup %3612 }
 0xb7b   :  { %1035 = vadd.xlane.f32.xlu0 %v1034_v25  ;;  %v1037_v27 = vsel %vm408_vm7, %v3613_v26, 0.0 }
 0xb7f   :  { %1038 = vadd.xlane.f32.xlu0 %v1037_v27 }
 0xb95   :  { %3468 = vrot.lane.b32.xlu0 %v3467_v19, %s4417_s22 }
 0xc08   :  { %v1036_v29 = vpop.xlane.xlu0 %1035 }
 0xc09   :  { %3614 = vrcp.f32 %v1036_v29 }
 0xc0c   :  { %v1039_v30 = vpop.xlane.xlu0 %1038 }
 0xc0d   :  { %3616 = vrcp.f32 %v1039_v30 }
 0xc10   :  { %v3469_v40 = vpop.permute.xlu0 %3468 }
 0xc11   :  { %v3471_v41 = vunpack.i.h.bf16 %v3469_v40  ;;  %v3470_v42 = vunpack.i.l.bf16 %v3469_v40 }
 0xc13   :  { %v3615_v31 = vpop.eup %3614  ;;  %v1157_v54 = vsel %vm316_vm4, %v3947_v38, %v3471_v41  ;;  %v1156_v43 = vsel %vm316_vm4, %v3949_v39, %v3470_v42  ;;  %v2897_v38 = vld [vmem:[%s4401_s7] ss:$0 sm:$0xff] }
 0xc14   :  { %v1041_v32 = vmul.f32 %v3615_v31, %v3611_v56  ;;  %v1159_v49 = vsel %vm1158_vm11, %v1156_v43, %v3475_v45  ;;  %v1160_v50 = vsel %vm1158_vm11, %v1157_v54, %v3476_v44  ;;  %v3558_v31 = vld [vmem:[%s4404_s10] sm:$0xff]  }
 0xc16   :  { %3165 = vmatprep.mubr.msk.f32.mxu0 %vm404_vm6, %v1041_v32  ;;  %v3559_v32 = vld [vmem:[%s4404_s10 + $0x8] sm:$0xff]  }
 0xc17   :  { %v3617_v33 = vpop.eup %3616 }
 0xc18   :  { %v1043_v34 = vmul.f32 %v3617_v33, %v3613_v26  ;;  %v3560_v33 = vld [vmem:[%s4404_s10 + $0x10] sm:$0xff]  }
 0xc1a   :  { %3166 = vmatmul.mubr.msk.f32.vlgmr.msra.gmra.mrb[8].mxu0 %vm404_vm6, %v1043_v34  ;;  %v3561_v34 = vld [vmem:[%s4404_s10 + $0x18] sm:$0xff]  }
 0xc1b   :  { %3180 = vmatprep.mubr.msk.bf16.mxu0 %vm3702_vm3, %v3701_v36  ;;  %3177 = vmatpush3.bf16.msra.mxu0 %v3556_v13 }
 0xc1c   :  { %3178 = vmatprep.subr.bf16.mxu0 %v3701_v36 }
 0xc1f   :  { %3179 = vmatpush3.bf16.msra.mxu0 %v3557_v14 }
 0xc20   :  { %3204 = vmatprep.subr.bf16.mxu0 %v3701_v36 }
 0xced   :  { %v3167_v19 = vpop.f32.mrb[8].mxu0 }
 0xcee   :  { %v1123_v35 = vpop.f32.mrb[9].mxu0 }
 0xcef   :  { %v3477_v37 = vpack.i.bf16 %v3167_v19, %v1123_v35  ;;  %v3564_v19 = vld [vmem:[%s4404_s10 + $0x30] sm:$0xff]   ;;  %v3565_v35 = vld [vmem:[%s4404_s10 + $0x38] sm:$0xff]  }
 0xcf1   :  { %3478 = vrot.lane.b32.xlu1 %v3477_v37, %s4416_s18  ;;  %v2901_v37 = vld [vmem:[%s4403_s9] ss:$0 sm:$0xff]  ;;  %s4434_s18 = smov 24  }
 0xd63   :  { %v3479_v46 = vpop.permute.xlu1 %3478 }
 0xd64   :  { %v3481_v47 = vunpack.i.h.bf16 %v3479_v46  ;;  %v3480_v48 = vunpack.i.l.bf16 %v3479_v46 }
 0xd66   :  { %v1163_v52 = vsel %vm1161_vm12, %v1160_v50, %v3481_v47  ;;  %v1162_v53 = vsel %vm1161_vm12, %v1159_v49, %v3480_v48 }
 0xd67   :  { %v1164_v55 = vpack.c.bf16 %v1163_v52, %v1162_v53 }
 0xd69   :  { %3173 = vmatmul.mubr.msk.bf16.vlgmr.msra.gmra.mrb[16].mxu1 %vm213_vm1, %v1164_v55 }
 0xd6a   :  { %3200 = vmatprep.mubr.msk.bf16.mxu1 %vm3702_vm3, %v3701_v36  ;;  %3185 = vmatpush3.bf16.msra.mxu1 %v3558_v31 }
 0xd6b   :  { %3186 = vmatprep.subr.bf16.mxu1 %v3701_v36 }
 0xd6e   :  { %3187 = vmatpush3.bf16.msra.mxu1 %v3559_v32 }
 0xd6f   :  { %3188 = vmatprep.subr.bf16.mxu1 %v3701_v36 }
 0xd72   :  { %3189 = vmatpush3.bf16.msra.mxu1 %v3560_v33 }
 0xd73   :  { %3190 = vmatprep.subr.bf16.mxu1 %v3701_v36 }
 0xd76   :  { %3191 = vmatpush3.bf16.msra.mxu1 %v3561_v34 }
 0xd77   :  { %3192 = vmatprep.subr.bf16.mxu1 %v3701_v36 }
 0xd7a   :  { %3193 = vmatpush3.bf16.msra.mxu1 %v3562_v16 }
 0xd7b   :  { %3194 = vmatprep.subr.bf16.mxu1 %v3701_v36 }
 0xd7e   :  { %3195 = vmatpush3.bf16.msra.mxu1 %v3563_v17 }
 0xd7f   :  { %3196 = vmatprep.subr.bf16.mxu1 %v3701_v36 }
 0xd82   :  { %3197 = vmatpush3.bf16.msra.mxu1 %v3564_v19 }
 0xd83   :  { %3198 = vmatprep.subr.bf16.mxu1 %v3701_v36 }
 0xd86   :  { %3199 = vmatpush3.bf16.msra.mxu1 %v3565_v35 }
 0xe3c   :  { %v1225_v39 = vpop.f32.mrb[16].mxu1 }
 0xe3d   :  { %v1226_v57 = vadd.f32 %v2897_v38, %v1225_v39  ;;  %v3174_v58 = vpop.f32.mrb[17].mxu1 }
 0xe3e   :  { %v1228_v59 = vpop.f32.mrb[18].mxu1 }
 0xe3f   :  { %v4058_v61 = vadd.f32 %v1226_v57, %v3857_v18  ;;  %v1229_v62 = vadd.f32 %v2897_v38, %v1228_v59  ;;  %v3175_v63 = vpop.f32.mrb[19].mxu1 }
 0xe41   :  { %v4061_v1 = vadd.f32 %v1229_v62, %v3859_v21  ;;  %v1234_v2 = vsel %vm213_vm1, %v4058_v61, 0.0 }
 0xe42   :  { %1235 = vadd.xlane.f32.xlu1 %v1234_v2 }
 0xe43   :  { %v1237_v4 = vsel %vm217_vm2, %v4061_v1, 0.0 }
 0xe44   :  { %1238 = vadd.xlane.f32.xlu0 %v1237_v4 }
 0xecf   :  { %v1236_v5 = vpop.xlane.xlu1 %1235 }
 0xed0   :  { %v1240_v6 = vmul.f32 0.03125, %v1236_v5  ;;  %v2905_v5 = vld [vmem:[%s4405_s11] ss:$0 sm:$0xff] }
 0xed1   :  { %v1239_v7 = vpop.xlane.xlu0 %1238 }
 0xed2   :  { %v1242_v8 = vsub.f32 %v4058_v61, %v1240_v6  ;;  %v1241_v18 = vmul.f32 0.03125, %v1239_v7 }
 0xed4   :  { %v1243_v9 = vsub.f32 %v4061_v1, %v1241_v18  ;;  %v1244_v10 = vmul.f32 %v1242_v8, %v1242_v8 }
 0xed6   :  { %v1246_v21 = vsel %vm213_vm1, %v1244_v10, 0.0  ;;  %v1245_v11 = vmul.f32 %v1243_v9, %v1243_v9 }
 0xed7   :  { %1247 = vadd.xlane.f32.xlu0 %v1246_v21 }
 0xed8   :  { %v1249_v12 = vsel %vm217_vm2, %v1245_v11, 0.0 }
 0xedb   :  { %1250 = vadd.xlane.f32.xlu0 %v1249_v12 }
 0xf64   :  { %v1248_v15 = vpop.xlane.xlu0 %1247 }
 0xf65   :  { %v1252_v20 = vmul.f32 0.03125, %v1248_v15 }
 0xf67   :  { %v1254_v22 = vadd.f32 1e-06, %v1252_v20 }
 0xf68   :  { %v1251_v23 = vpop.xlane.xlu0 %1250 }
 0xf69   :  { %v1253_v24 = vmul.f32 0.03125, %v1251_v23  ;;  %3618 = vrsqrt.f32 %v1254_v22 }
 0xf6b   :  { %v1255_v56 = vadd.f32 1e-06, %v1253_v24 }
 0xf6d   :  { %3620 = vrsqrt.f32 %v1255_v56 }
 0xf73   :  { %v3619_v25 = vpop.eup %3618 }
 0xf74   :  { %v1258_v27 = vmul.f32 %v3619_v25, %v1242_v8 }
 0xf77   :  { %v3621_v26 = vpop.eup %3620 }
 0xf78   :  { %v1259_v29 = vmul.f32 %v3621_v26, %v1243_v9  ;;  %v3566_v26 = vld [vmem:[%s4398_s4 + $0x10] sm:$0xff]  }
 0xf7a   :  { %v1260_v30 = vpack.c.bf16 %v1259_v29, %v1258_v27  ;;  %v3567_v27 = vld [vmem:[%s4398_s4 + $0x18] sm:$0xff]   ;;  %s4429_s4 = smov 72  }
 0xf7c   :  { %3181 = vmatmul.mubr.msk.bf16.vlgmr.msra.gmra.mrb[12].mxu0 %vm213_vm1, %v1260_v30 }
 0xf7d   :  { %3208 = vmatprep.mubr.msk.bf16.mxu0 %vm3702_vm3, %v3701_v36  ;;  %3205 = vmatpush3.bf16.msra.mxu0 %v3566_v26 }
 0xf7e   :  { %3206 = vmatprep.subr.bf16.mxu0 %v3701_v36 }
 0xf81   :  { %3207 = vmatpush3.bf16.msra.mxu0 %v3567_v27 }
0x104f   :  { %v1321_v40 = vpop.f32.mrb[12].mxu0 }
0x1050   :  { %v1322_v41 = vadd.f32 %v2901_v37, %v1321_v40  ;;  %v3182_v42 = vpop.f32.mrb[13].mxu0  ;;  %v2919_v40 = vld [vmem:[%s4399_s5 + $0x1] ss:$0 sm:$0xff]  ;;  %s4430_s5 = smov 104  }
0x1051   :  { %v1324_v51 = vpop.f32.mrb[14].mxu0 }
0x1052   :  { %v1328_v54 = vmul.f32 %v1322_v41, %v1322_v41  ;;  %v1325_v43 = vadd.f32 %v2901_v37, %v1324_v51  ;;  %v3183_v44 = vpop.f32.mrb[15].mxu0 }
0x1054   :  { %v1330_v45 = vmul.f32 %v1328_v54, %v1322_v41  ;;  %v1329_v46 = vmul.f32 %v1325_v43, %v1325_v43 }
0x1056   :  { %v1332_v47 = vmul.f32 0.044715, %v1330_v45  ;;  %v1331_v48 = vmul.f32 %v1329_v46, %v1325_v43 }
0x1058   :  { %v1334_v49 = vadd.f32 %v1332_v47, %v1322_v41  ;;  %v1333_v50 = vmul.f32 0.044715, %v1331_v48 }
0x105a   :  { %v1336_v52 = vmul.f32 0.7978846, %v1334_v49  ;;  %v1335_v53 = vadd.f32 %v1333_v50, %v1325_v43 }
0x105c   :  { %3622 = vtanh.f32 %v1336_v52  ;;  %v1337_v55 = vmul.f32 0.7978846, %v1335_v53 }
0x105e   :  { %3624 = vtanh.f32 %v1337_v55 }
0x1066   :  { %v3623_v38 = vpop.eup %3622 }
0x1067   :  { %v1340_v39 = vadd.f32 1.0, %v3623_v38 }
0x1068   :  { %v3625_v57 = vpop.eup %3624 }
0x1069   :  { %v1342_v58 = vmul.f32 0.5, %v1340_v39  ;;  %v1341_v59 = vadd.f32 1.0, %v3625_v57 }
0x106b   :  { %v1343_v62 = vmul.f32 0.5, %v1341_v59  ;;  %v1344_v63 = vmul.f32 %v1342_v58, %v1322_v41 }
0x106d   :  { %v1345_v2 = vmul.f32 %v1343_v62, %v1325_v43 }
0x106f   :  { %v1346_v4 = vpack.c.bf16 %v1345_v2, %v1344_v63 }
0x1071   :  { %3201 = vmatmul.mubr.bf16.vlgmr.msra.gmra.mrb[20].mxu1 %v1346_v4 }
0x1144   :  { %v1452_v6 = vpop.f32.mrb[20].mxu1 }
0x1145   :  { %v1453_v7 = vadd.f32 %v2905_v5, %v1452_v6  ;;  %v3202_v8 = vpop.f32.mrb[21].mxu1 }
0x1146   :  { %v1455_v18 = vpop.f32.mrb[22].mxu1 }
0x1147   :  { %v4120_v9 = vadd.f32 %v1453_v7, %v4058_v61  ;;  %v1456_v10 = vadd.f32 %v2905_v5, %v1455_v18  ;;  %v3203_v21 = vpop.f32.mrb[23].mxu1 }
0x1149   :  { %v4123_v11 = vadd.f32 %v1456_v10, %v4061_v1  ;;  %v1461_v12 = vsel %vm213_vm1, %v4120_v9, 0.0 }
0x114a   :  { %1462 = vadd.xlane.f32.xlu1 %v1461_v12 }
0x114b   :  { %v1464_v13 = vsel %vm217_vm2, %v4123_v11, 0.0 }
0x114c   :  { %1465 = vadd.xlane.f32.xlu0 %v1464_v13 }
0x11d7   :  { %v1463_v14 = vpop.xlane.xlu1 %1462 }
0x11d8   :  { %v1467_v15 = vmul.f32 0.03125, %v1463_v14 }
0x11d9   :  { %v1466_v20 = vpop.xlane.xlu0 %1465 }
0x11da   :  { %v1469_v22 = vsub.f32 %v4120_v9, %v1467_v15  ;;  %v1468_v61 = vmul.f32 0.03125, %v1466_v20 }
0x11dc   :  { %v1470_v23 = vsub.f32 %v4123_v11, %v1468_v61  ;;  %v1471_v24 = vmul.f32 %v1469_v22, %v1469_v22 }
0x11de   :  { %v1473_v1 = vsel %vm213_vm1, %v1471_v24, 0.0  ;;  %v1472_v56 = vmul.f32 %v1470_v23, %v1470_v23 }
0x11df   :  { %1474 = vadd.xlane.f32.xlu1 %v1473_v1 }
0x11e0   :  { %v1476_v25 = vsel %vm217_vm2, %v1472_v56, 0.0 }
0x11e1   :  { %1477 = vadd.xlane.f32.xlu0 %v1476_v25 }
0x126c   :  { %v1475_v29 = vpop.xlane.xlu1 %1474 }
0x126d   :  { %v1479_v30 = vmul.f32 0.03125, %v1475_v29 }
0x126e   :  { %v1478_v31 = vpop.xlane.xlu0 %1477 }
0x126f   :  { %v1481_v32 = vadd.f32 1e-06, %v1479_v30  ;;  %v1480_v33 = vmul.f32 0.03125, %v1478_v31 }
0x1271   :  { %3626 = vrsqrt.f32 %v1481_v32  ;;  %v1482_v34 = vadd.f32 1e-06, %v1480_v33 }
0x1273   :  { %3628 = vrsqrt.f32 %v1482_v34 }
0x127b   :  { %v3627_v16 = vpop.eup %3626 }
0x127c   :  { %v1485_v19 = vmul.f32 %v3627_v16, %v1469_v22 }
0x127d   :  { %v3629_v17 = vpop.eup %3628 }
0x127e   :  { %v1486_v35 = vmul.f32 %v3629_v17, %v1470_v23 }
0x1280   :  { %v1487_v37 = vpack.c.bf16 %v1486_v35, %v1485_v19 }
0x1282   :  { %3209 = vmatmul.mubr.msk.bf16.vlgmr.msra.gmra.mrb[16].mxu0 %vm213_vm1, %v1487_v37 }
0x1355   :  { %v1550_v41 = vpop.f32.mrb[16].mxu0 }
0x1356   :  { %v4144_v42 = vadd.f32 %v2919_v40, %v1550_v41  ;;  %v3210_v51 = vpop.f32.mrb[17].mxu0 }
0x1357   :  { %v1553_v54 = vpop.f32.mrb[18].mxu0 }
0x1358   :  { %v4146_v43 = vadd.f32 %v2919_v40, %v1553_v54  ;;  %v3211_v44 = vpop.f32.mrb[19].mxu0  ;;  %3216 = vmatprep.mubr.msk.f32.mxu0 %vm316_vm4, %v4144_v42 }
0x135a   :  { %v4152_v45 = vpack.i.bf16 %v4146_v43, %v4144_v42 }
0x135c   :  { %3483 = vrot.lane.b32.xlu1 %v4152_v45, %s3703_s19 }
0x1360   :  { %3488 = vrot.lane.b32.xlu1 %v4152_v45, %s3706_s26 }
0x1364   :  { %1760 = vrot.lane.b32.xlu1 %v4144_v42, %s3705_s20 }
0x1368   :  { %3498 = vrot.lane.b32.xlu1 %v4152_v45, %s3710_s3 }
0x136c   :  { %1762 = vrot.lane.b32.xlu1 %v4146_v43, %s3705_s20 }
0x1370   :  { %1965 = vrot.lane.b32.xlu1 %v4144_v42, %s3709_s28 }
0x1374   :  { %1967 = vrot.lane.b32.xlu1 %v4146_v43, %s3709_s28  ;;  %s4432_s28 = smov 16  }
0x13ce   :  { %v3484_v46 = vpop.permute.xlu1 %3483 }
0x13cf   :  { %v3486_v47 = vunpack.i.h.bf16 %v3484_v46  ;;  %v3485_v48 = vunpack.i.l.bf16 %v3484_v46 }
0x13d1   :  { %v3360_v49 = vpack.c.bf16 %v3486_v47, %v3485_v48 }
0x13d2   :  { %v3489_v50 = vpop.permute.xlu1 %3488 }
0x13d3   :  { %v3491_v52 = vunpack.i.h.bf16 %v3489_v50  ;;  %v3490_v53 = vunpack.i.l.bf16 %v3489_v50  ;;  %3362 = vmatprep.subr.msk.bf16.mxu0 %vm3903_vm5, %v3360_v49 }
0x13d4   :  { %3365 = vmatpush3.bf16.xpose.msk.msra.mxu0 %vm3903_vm5, %v3360_v49 }
0x13d5   :  { %v3366_v55 = vpack.c.bf16 %v3491_v52, %v3490_v53 }
0x13d6   :  { %v1761_v38 = vpop.permute.xlu1 %1760 }
0x13d7   :  { %3368 = vmatprep.subr.msk.bf16.mxu0 %vm3931_vm10, %v3366_v55 }
0x13da   :  { %v3499_v39 = vpop.permute.xlu1 %3498 }
0x13db   :  { %v3501_v57 = vunpack.i.h.bf16 %v3499_v39  ;;  %v3500_v58 = vunpack.i.l.bf16 %v3499_v39  ;;  %3217 = vmatmul.mubr.msk.f32.vlgmr.msra.gmra.mrb[10].mxu0 %vm316_vm4, %v4146_v43 }
0x13dc   :  { %3371 = vmatpush3.bf16.msk.msra.mxu0 %vm3931_vm10, %v3366_v55 }
0x13dd   :  { %v3384_v59 = vpack.c.bf16 %v3501_v57, %v3500_v58 }
0x13de   :  { %v1763_v62 = vpop.permute.xlu1 %1762 }
0x13df   :  { %3386 = vmatprep.subr.msk.bf16.mxu1 %vm3903_vm5, %v3384_v59 }
0x13e0   :  { %3389 = vmatpush3.bf16.xpose.msk.msra.mxu1 %vm3903_vm5, %v3384_v59 }
0x13e2   :  { %v1966_v63 = vpop.permute.xlu1 %1965 }
0x13e3   :  { %3244 = vmatprep.mubr.msk.f32.mxu1 %vm316_vm4, %v1966_v63 }
0x13e6   :  { %v1968_v2 = vpop.permute.xlu1 %1967 }
0x13e7   :  { %3245 = vmatmul.mubr.msk.f32.vlgmr.msra.gmra.mrb[14].mxu1 %vm316_vm4, %v1968_v2 }
0x14ae   :  { %v3218_v4 = vpop.f32.mrb[10].mxu0 }
0x14af   :  { %v1637_v5 = vpop.f32.mrb[11].mxu0  ;;  %v1647_v6 = vmul.f32 0.35355338, %v3218_v4 }
0x14b0   :  { %v1646_v7 = vmul.f32 0.35355338, %v1637_v5 }
0x14b1   :  { %v1649_v10 = vadd.f32 %v1647_v6, %v3921_v3 }
0x14b2   :  { %v1648_v8 = vadd.f32 %v1646_v7, %v3916_v0 }
0x14b3   :  { %v1653_v21 = vsel %vm408_vm7, %v1649_v10, -inf }
0x14b4   :  { %v1650_v18 = vsel %vm404_vm6, %v1648_v8, -inf }
0x14b5   :  { %1651 = vmax.xlane.f32.xlu0 %v1650_v18 }
0x14b9   :  { %1654 = vmax.xlane.f32.xlu0 %v1653_v21 }
0x14ba   :  { %v3246_v12 = vpop.f32.mrb[14].mxu1 }
0x14bb   :  { %v2047_v13 = vpop.f32.mrb[15].mxu1  ;;  %v2057_v47 = vmul.f32 0.35355338, %v3246_v12 }
0x14bc   :  { %v2056_v40 = vmul.f32 0.35355338, %v2047_v13 }
0x14bd   :  { %v2059_v53 = vadd.f32 %v2057_v47, %v3921_v3 }
0x14be   :  { %v2058_v49 = vadd.f32 %v2056_v40, %v3916_v0 }
0x14bf   :  { %v2063_v55 = vsel %vm408_vm7, %v2059_v53, -inf }
0x14c0   :  { %v2060_v52 = vsel %vm404_vm6, %v2058_v49, -inf }
0x1542   :  { %v1652_v14 = vpop.xlane.xlu0 %1651 }
0x1543   :  { %v1656_v15 = vsub.f32 %v1648_v8, %v1652_v14 }
0x1545   :  { %v1658_v61 = vmul.f32 1.442695, %v1656_v15 }
0x1546   :  { %v1655_v20 = vpop.xlane.xlu0 %1654 }
0x1547   :  { %v1657_v22 = vsub.f32 %v1649_v10, %v1655_v20 }
0x1549   :  { %v1660_v23 = vmul.f32 1.442695, %v1657_v22 }
0x154b   :  { %3630 = vpow2.f32 %v1660_v23 }
0x154c   :  { %3632 = vpow2.f32 %v1658_v61 }
0x1555   :  { %v3631_v24 = vpop.eup %3630 }
0x1556   :  { %v1665_v1 = vsel %vm408_vm7, %v3631_v24, 0.0  ;;  %v3633_v56 = vpop.eup %3632 }
0x1557   :  { %1666 = vadd.xlane.f32.xlu0 %v1665_v1  ;;  %v1662_v25 = vsel %vm404_vm6, %v3633_v56, 0.0 }
0x155b   :  { %1663 = vadd.xlane.f32.xlu0 %v1662_v25 }
0x1571   :  { %3493 = vrot.lane.b32.xlu0 %v4152_v45, %s3704_s1 }
0x15e4   :  { %v1667_v26 = vpop.xlane.xlu0 %1666 }
0x15e5   :  { %3634 = vrcp.f32 %v1667_v26 }
0x15e8   :  { %v1664_v27 = vpop.xlane.xlu0 %1663 }
0x15e9   :  { %3636 = vrcp.f32 %v1664_v27 }
0x15ec   :  { %v3494_v29 = vpop.permute.xlu0 %3493 }
0x15ed   :  { %v3496_v30 = vunpack.i.h.bf16 %v3494_v29  ;;  %v3495_v31 = vunpack.i.l.bf16 %v3494_v29 }
0x15ef   :  { %v3372_v32 = vpack.c.bf16 %v3496_v30, %v3495_v31  ;;  %v3635_v33 = vpop.eup %3634 }
0x15f0   :  { %v1671_v17 = vmul.f32 %v3635_v33, %v3631_v24 }
0x15f1   :  { %3374 = vmatprep.subr.msk.bf16.mxu0 %vm3903_vm5, %v3372_v32 }
0x15f3   :  { %v3637_v34 = vpop.eup %3636 }
0x15f4   :  { %v1669_v16 = vmul.f32 %v3637_v34, %v3633_v56 }
0x15f6   :  { %3223 = vmatprep.mubr.msk.f32.mxu0 %vm404_vm6, %v1669_v16 }
0x15f7   :  { %3224 = vmatmul.mubr.msk.f32.vlgmr.msra.gmra.mrb[20].mxu0 %vm404_vm6, %v1671_v17 }
0x15f8   :  { %3377 = vmatpush3.bf16.xpose.msk.msra.mxu0 %vm3903_vm5, %v3372_v32  ;;  %3230 = vmatprep.mubr.msk.f32.mxu0 %vm316_vm4, %v1761_v38 }
0x15ff   :  { %3231 = vmatmul.mubr.msk.f32.vlgmr.msra.gmra.mrb[22].mxu0 %vm316_vm4, %v1763_v62 }
0x16ca   :  { %v4200_v19 = vpop.f32.mrb[20].mxu0 }
0x16cb   :  { %v4202_v35 = vpop.f32.mrb[21].mxu0 }
0x16d2   :  { %v3232_v37 = vpop.f32.mrb[22].mxu0 }
0x16d3   :  { %v1852_v41 = vmul.f32 0.35355338, %v3232_v37  ;;  %v1842_v51 = vpop.f32.mrb[23].mxu0 }
0x16d4   :  { %v1851_v54 = vmul.f32 0.35355338, %v1842_v51 }
0x16d5   :  { %v1854_v44 = vadd.f32 %v1852_v41, %v3921_v3 }
0x16d6   :  { %v1853_v46 = vadd.f32 %v1851_v54, %v3916_v0 }
0x16d7   :  { %v1858_v48 = vsel %vm408_vm7, %v1854_v44, -inf }
0x16d8   :  { %1859 = vmax.xlane.f32.xlu0 %v1858_v48  ;;  %v1855_v50 = vsel %vm404_vm6, %v1853_v46, -inf }
0x16d9   :  { %1856 = vmax.xlane.f32.xlu1 %v1855_v50 }
0x16dc   :  { %2061 = vmax.xlane.f32.xlu0 %v2060_v52 }
0x16e0   :  { %2064 = vmax.xlane.f32.xlu0 %v2063_v55 }
0x1765   :  { %v1860_v38 = vpop.xlane.xlu0 %1859 }
0x1766   :  { %v1862_v58 = vsub.f32 %v1854_v44, %v1860_v38  ;;  %v1857_v18 = vpop.xlane.xlu1 %1856 }
0x1767   :  { %v1861_v10 = vsub.f32 %v1853_v46, %v1857_v18 }
0x1768   :  { %v1865_v63 = vmul.f32 1.442695, %v1862_v58 }
0x1769   :  { %v2062_v39 = vpop.xlane.xlu0 %2061  ;;  %v1863_v21 = vmul.f32 1.442695, %v1861_v10 }
0x176a   :  { %v2066_v57 = vsub.f32 %v2058_v49, %v2062_v39  ;;  %v3675_v39 = vld [vmem:[%s4396_s2] sm:$0xff]  ;;  %s4433_s2 = smov 40  }
0x176c   :  { %v2068_v59 = vmul.f32 1.442695, %v2066_v57 }
0x176d   :  { %v2065_v62 = vpop.xlane.xlu0 %2064 }
0x176e   :  { %3638 = vpow2.f32 %v2068_v59  ;;  %v2067_v0 = vsub.f32 %v2059_v53, %v2065_v62 }
0x1770   :  { %v2070_v2 = vmul.f32 1.442695, %v2067_v0 }
0x1772   :  { %3640 = vpow2.f32 %v2070_v2 }
0x1773   :  { %3642 = vpow2.f32 %v1865_v63 }
0x1774   :  { %3644 = vpow2.f32 %v1863_v21 }
0x1778   :  { %v3639_v4 = vpop.eup %3638 }
0x1779   :  { %v2072_v5 = vsel %vm404_vm6, %v3639_v4, 0.0 }
0x177a   :  { %2073 = vadd.xlane.f32.xlu1 %v2072_v5 }
0x177c   :  { %v3641_v3 = vpop.eup %3640 }
0x177d   :  { %v2075_v6 = vsel %vm408_vm7, %v3641_v3, 0.0  ;;  %v3643_v7 = vpop.eup %3642 }
0x177e   :  { %2076 = vadd.xlane.f32.xlu0 %v2075_v6  ;;  %v1870_v8 = vsel %vm408_vm7, %v3643_v7, 0.0  ;;  %v3645_v12 = vpop.eup %3644 }
0x177f   :  { %v1867_v13 = vsel %vm404_vm6, %v3645_v12, 0.0 }
0x1782   :  { %1871 = vadd.xlane.f32.xlu0 %v1870_v8 }
0x178b   :  { %3503 = vrot.lane.b32.xlu1 %v4152_v45, %s3708_s27  ;;  %s4431_s27 = smov 8  }
0x1798   :  { %3508 = vrot.lane.b32.xlu0 %v4152_v45, %s3711_s21 }
0x17af   :  { %1868 = vadd.xlane.f32.xlu1 %v1867_v13 }
0x17c0   :  { %3513 = vrot.lane.b32.xlu1 %v4152_v45, %s4429_s4 }
0x17c4   :  { %2170 = vrot.lane.b32.xlu1 %v4144_v42, %s4430_s5 }
0x17c8   :  { %2172 = vrot.lane.b32.xlu1 %v4146_v43, %s4430_s5 }
0x1807   :  { %v2074_v14 = vpop.xlane.xlu1 %2073 }
0x1808   :  { %3646 = vrcp.f32 %v2074_v14 }
0x180b   :  { %v3504_v15 = vpop.permute.xlu1 %3503  ;;  %v2077_v20 = vpop.xlane.xlu0 %2076 }
0x180c   :  { %v3506_v22 = vunpack.i.h.bf16 %v3504_v15  ;;  %v3505_v61 = vunpack.i.l.bf16 %v3504_v15 }
0x180e   :  { %v3378_v23 = vpack.c.bf16 %v3506_v22, %v3505_v61  ;;  %v3568_v61 = vld [vmem:[%s4400_s6 + $0x10] sm:$0xff]  }
0x180f   :  { %v1872_v24 = vpop.xlane.xlu0 %1871 }
0x1810   :  { %3380 = vmatprep.subr.msk.bf16.mxu0 %vm3931_vm10, %v3378_v23  ;;  %3648 = vrcp.f32 %v1872_v24 }
0x1811   :  { %3383 = vmatpush3.bf16.msk.msra.mxu0 %vm3931_vm10, %v3378_v23 }
0x1812   :  { %v3647_v27 = vpop.eup %3646 }
0x1813   :  { %v3509_v1 = vpop.permute.xlu0 %3508  ;;  %v2079_v17 = vmul.f32 %v3647_v27, %v3639_v4 }
0x1814   :  { %v3511_v56 = vunpack.i.h.bf16 %v3509_v1  ;;  %v3510_v25 = vunpack.i.l.bf16 %v3509_v1 }
0x1816   :  { %v3390_v42 = vpack.c.bf16 %v3511_v56, %v3510_v25 }
0x1818   :  { %3392 = vmatprep.subr.msk.bf16.mxu0 %vm3931_vm10, %v3390_v42 }
0x181a   :  { %v3649_v29 = vpop.eup %3648 }
0x181b   :  { %v1876_v34 = vmul.f32 %v3649_v29, %v3643_v7 }
0x183c   :  { %v1869_v43 = vpop.xlane.xlu1 %1868 }
0x183d   :  { %3650 = vrcp.f32 %v1869_v43 }
0x183e   :  { %3652 = vrcp.f32 %v2077_v20 }
0x1840   :  { %v3514_v26 = vpop.permute.xlu1 %3513 }
0x1841   :  { %v3516_v31 = vunpack.i.h.bf16 %v3514_v26  ;;  %v3515_v32 = vunpack.i.l.bf16 %v3514_v26 }
0x1843   :  { %v3396_v37 = vpack.c.bf16 %v3516_v31, %v3515_v32 }
0x1844   :  { %v2171_v41 = vpop.permute.xlu1 %2170 }
0x1847   :  { %v3651_v30 = vpop.eup %3650 }
0x1848   :  { %v1874_v33 = vmul.f32 %v3651_v30, %v3645_v12  ;;  %v3653_v16 = vpop.eup %3652  ;;  %v2173_v51 = vpop.permute.xlu1 %2172 }
0x1849   :  { %v2081_v40 = vmul.f32 %v3653_v16, %v3641_v3 }
0x184a   :  { %3237 = vmatprep.mubr.msk.f32.mxu0 %vm404_vm6, %v1874_v33 }
0x184b   :  { %3238 = vmatmul.mubr.msk.f32.vlgmr.msra.gmra.mrb[24].mxu0 %vm404_vm6, %v1876_v34 }
0x184c   :  { %3395 = vmatpush3.bf16.msk.msra.mxu0 %vm3931_vm10, %v3390_v42  ;;  %3251 = vmatprep.mubr.msk.f32.mxu0 %vm404_vm6, %v2079_v17 }
0x184d   :  { %3398 = vmatprep.subr.msk.bf16.mxu0 %vm3903_vm5, %v3396_v37 }
0x184f   :  { %3252 = vmatmul.mubr.msk.f32.vlgmr.msra.gmra.mrb[26].mxu0 %vm404_vm6, %v2081_v40 }
0x1850   :  { %3258 = vmatprep.mubr.msk.f32.mxu0 %vm316_vm4, %v2171_v41 }
0x1855   :  { %3401 = vmatpush3.bf16.xpose.msk.msra.mxu0 %vm3903_vm5, %v3396_v37 }
0x1856   :  { %3276 = vmatprep.subr.bf16.mxu0 %v3701_v36 }
0x185c   :  { %3259 = vmatmul.mubr.msk.f32.vlgmr.msra.gmra.mrb[28].mxu0 %vm316_vm4, %v2173_v51 }
0x185d   :  { %3280 = vmatprep.mubr.msk.bf16.mxu0 %vm3702_vm3, %v3701_v36 }
0x191e   :  { %v3239_v54 = vpop.f32.mrb[24].mxu0 }
0x191f   :  { %v1956_v44 = vpop.f32.mrb[25].mxu0 }
0x1920   :  { %v3522_v46 = vpack.i.bf16 %v3239_v54, %v1956_v44 }
0x1922   :  { %v3253_v47 = vpop.f32.mrb[26].mxu0 }
0x1923   :  { %v2161_v48 = vpop.f32.mrb[27].mxu0 }
0x1924   :  { %v3527_v49 = vpack.i.bf16 %v3253_v47, %v2161_v48 }
0x192f   :  { %v3260_v50 = vpop.f32.mrb[28].mxu0 }
0x1930   :  { %v2262_v52 = vmul.f32 0.35355338, %v3260_v50  ;;  %v2252_v53 = vpop.f32.mrb[29].mxu0 }
0x1931   :  { %v2261_v55 = vmul.f32 0.35355338, %v2252_v53 }
0x1932   :  { %v2264_v38 = vadd.f32 %v3674_v60, %v2262_v52 }
0x1933   :  { %v2263_v57 = vadd.f32 %v3675_v39, %v2261_v55 }
0x1934   :  { %v2268_v58 = vsel %vm408_vm7, %v2264_v38, -inf }
0x1935   :  { %2269 = vmax.xlane.f32.xlu1 %v2268_v58  ;;  %v2265_v59 = vsel %vm404_vm6, %v2263_v57, -inf }
0x1936   :  { %2266 = vmax.xlane.f32.xlu0 %v2265_v59  ;;  %v3570_v59 = vld [vmem:[%s4402_s8 + $0x10] sm:$0xff]  }
0x1937   :  { %3277 = vmatpush3.bf16.msra.mxu0 %v3570_v59 }
0x1938   :  { %3278 = vmatprep.subr.bf16.mxu0 %v3701_v36 }
0x1946   :  { %3523 = vrot.lane.b32.xlu1 %v3522_v46, %s4431_s27 }
0x194a   :  { %3528 = vrot.lane.b32.xlu1 %v3527_v49, %s4432_s28 }
0x19c2   :  { %v2270_v62 = vpop.xlane.xlu1 %2269 }
0x19c3   :  { %v2272_v0 = vsub.f32 %v2264_v38, %v2270_v62  ;;  %v2267_v63 = vpop.xlane.xlu0 %2266  ;;  %v3571_v62 = vld [vmem:[%s4402_s8 + $0x18] sm:$0xff]  }
0x19c4   :  { %v2271_v2 = vsub.f32 %v2263_v57, %v2267_v63  ;;  %3279 = vmatpush3.bf16.msra.mxu0 %v3571_v62 }
0x19c5   :  { %v2275_v4 = vmul.f32 1.442695, %v2272_v0  ;;  %3304 = vmatprep.subr.bf16.mxu0 %v3701_v36 }
0x19c6   :  { %v2273_v5 = vmul.f32 1.442695, %v2271_v2  ;;  %v3524_v56 = vpop.permute.xlu1 %3523 }
0x19c7   :  { %3654 = vpow2.f32 %v2275_v4  ;;  %v3526_v42 = vunpack.i.h.bf16 %v3524_v56  ;;  %v3525_v43 = vunpack.i.l.bf16 %v3524_v56 }
0x19c8   :  { %3656 = vpow2.f32 %v2273_v5 }
0x19c9   :  { %v2400_v30 = vsel %vm316_vm4, %v4200_v19, %v3526_v42  ;;  %v2399_v31 = vsel %vm316_vm4, %v4202_v35, %v3525_v43  ;;  %v2956_v19 = vld [vmem:[%s4401_s7 + $0x1] ss:$0 sm:$0xff] }
0x19ca   :  { %v3529_v25 = vpop.permute.xlu1 %3528 }
0x19cb   :  { %v3531_v26 = vunpack.i.h.bf16 %v3529_v25  ;;  %v3530_v27 = vunpack.i.l.bf16 %v3529_v25 }
0x19cd   :  { %v2401_v34 = vsel %vm1158_vm11, %v2399_v31, %v3530_v27  ;;  %v2402_v16 = vsel %vm1158_vm11, %v2400_v30, %v3531_v26 }
0x19d1   :  { %v3655_v3 = vpop.eup %3654 }
0x19d2   :  { %v2280_v6 = vsel %vm408_vm7, %v3655_v3, 0.0  ;;  %v3657_v7 = vpop.eup %3656 }
0x19d3   :  { %2281 = vadd.xlane.f32.xlu0 %v2280_v6  ;;  %v2277_v8 = vsel %vm404_vm6, %v3657_v7, 0.0 }
0x19d7   :  { %2278 = vadd.xlane.f32.xlu0 %v2277_v8 }
0x19ed   :  { %3518 = vrot.lane.b32.xlu0 %v4152_v45, %s4433_s2 }
0x1a60   :  { %v2282_v18 = vpop.xlane.xlu0 %2281 }
0x1a61   :  { %3658 = vrcp.f32 %v2282_v18 }
0x1a64   :  { %v2279_v10 = vpop.xlane.xlu0 %2278 }
0x1a65   :  { %3660 = vrcp.f32 %v2279_v10 }
0x1a68   :  { %v3519_v21 = vpop.permute.xlu0 %3518 }
0x1a69   :  { %v3521_v12 = vunpack.i.h.bf16 %v3519_v21  ;;  %v3520_v13 = vunpack.i.l.bf16 %v3519_v21  ;;  %v3572_v21 = vld [vmem:[%s4404_s10 + $0x40] sm:$0xff]  }
0x1a6b   :  { %v3402_v14 = vpack.c.bf16 %v3521_v12, %v3520_v13  ;;  %v3659_v15 = vpop.eup %3658  ;;  %v3573_v12 = vld [vmem:[%s4404_s10 + $0x48] sm:$0xff]   ;;  %v3574_v13 = vld [vmem:[%s4404_s10 + $0x50] sm:$0xff]  }
0x1a6c   :  { %v2286_v45 = vmul.f32 %v3659_v15, %v3655_v3  ;;  %v3576_v15 = vld [vmem:[%s4404_s10 + $0x60] sm:$0xff]  }
0x1a6d   :  { %3404 = vmatprep.subr.msk.bf16.mxu1 %vm3931_vm10, %v3402_v14 }
0x1a6e   :  { %3407 = vmatpush3.bf16.msk.msra.mxu1 %vm3931_vm10, %v3402_v14  ;;  %v3575_v14 = vld [vmem:[%s4404_s10 + $0x58] sm:$0xff]  }
0x1a6f   :  { %v3661_v20 = vpop.eup %3660  ;;  %3268 = vmatprep.subr.bf16.mxu1 %v3701_v36 }
0x1a70   :  { %v2284_v22 = vmul.f32 %v3661_v20, %v3657_v7  ;;  %v3577_v20 = vld [vmem:[%s4404_s10 + $0x68] sm:$0xff]  }
0x1a72   :  { %3265 = vmatprep.mubr.msk.f32.mxu1 %vm404_vm6, %v2284_v22  ;;  %v3578_v22 = vld [vmem:[%s4404_s10 + $0x70] sm:$0xff]  }
0x1a73   :  { %3266 = vmatmul.mubr.msk.f32.vlgmr.msra.gmra.mrb[24].mxu1 %vm404_vm6, %v2286_v45  ;;  %v3579_v45 = vld [vmem:[%s4404_s10 + $0x78] sm:$0xff]  }
0x1a74   :  { %3272 = vmatprep.mubr.msk.bf16.mxu1 %vm3702_vm3, %v3701_v36  ;;  %3269 = vmatpush3.bf16.msra.mxu1 %v3568_v61  ;;  %v2965_v61 = vld [vmem:[%s4403_s9 + $0x1] ss:$0 sm:$0xff] }
0x1a75   :  { %3270 = vmatprep.subr.bf16.mxu1 %v3701_v36 }
0x1a78   :  { %3271 = vmatpush3.bf16.msra.mxu1 %v3569_v28 }
0x1a79   :  { %3284 = vmatprep.subr.bf16.mxu1 %v3701_v36 }
0x1b46   :  { %v3267_v23 = vpop.f32.mrb[24].mxu1 }
0x1b47   :  { %v2366_v24 = vpop.f32.mrb[25].mxu1 }
0x1b48   :  { %v3532_v1 = vpack.i.bf16 %v3267_v23, %v2366_v24 }
0x1b4a   :  { %3533 = vrot.lane.b32.xlu1 %v3532_v1, %s4434_s18 }
0x1bbc   :  { %v3534_v29 = vpop.permute.xlu1 %3533 }
0x1bbd   :  { %v3536_v32 = vunpack.i.h.bf16 %v3534_v29  ;;  %v3535_v33 = vunpack.i.l.bf16 %v3534_v29 }
0x1bbf   :  { %v2404_v17 = vsel %vm1161_vm12, %v2402_v16, %v3536_v32  ;;  %v2403_v37 = vsel %vm1161_vm12, %v2401_v34, %v3535_v33 }
0x1bc0   :  { %v2405_v40 = vpack.c.bf16 %v2404_v17, %v2403_v37 }
0x1bc2   :  { %3273 = vmatmul.mubr.msk.bf16.vlgmr.msra.gmra.mrb[28].mxu1 %vm213_vm1, %v2405_v40 }
0x1bc3   :  { %3300 = vmatprep.mubr.msk.bf16.mxu1 %vm3702_vm3, %v3701_v36  ;;  %3285 = vmatpush3.bf16.msra.mxu1 %v3572_v21 }
0x1bc4   :  { %3286 = vmatprep.subr.bf16.mxu1 %v3701_v36 }
0x1bc7   :  { %3287 = vmatpush3.bf16.msra.mxu1 %v3573_v12  ;;  %v2995_v12 = vld [vmem:[%s4406_s12] ss:$0 sm:$0xff]  ;;  %s3718_s12 = smov [#allocation2]  }
0x1bc8   :  { %3288 = vmatprep.subr.bf16.mxu1 %v3701_v36 }
0x1bcb   :  { %3289 = vmatpush3.bf16.msra.mxu1 %v3574_v13 }
0x1bcc   :  { %3290 = vmatprep.subr.bf16.mxu1 %v3701_v36 }
0x1bcf   :  { %3291 = vmatpush3.bf16.msra.mxu1 %v3575_v14  ;;  %v2996_v14 = vld [vmem:[%s4407_s13] ss:$0 sm:$0xff] }
0x1bd0   :  { %3292 = vmatprep.subr.bf16.mxu1 %v3701_v36 }
0x1bd3   :  { %3293 = vmatpush3.bf16.msra.mxu1 %v3576_v15 }
0x1bd4   :  { %3294 = vmatprep.subr.bf16.mxu1 %v3701_v36 }
0x1bd7   :  { %3295 = vmatpush3.bf16.msra.mxu1 %v3577_v20 }
0x1bd8   :  { %3296 = vmatprep.subr.bf16.mxu1 %v3701_v36 }
0x1bdb   :  { %3297 = vmatpush3.bf16.msra.mxu1 %v3578_v22 }
0x1bdc   :  { %3298 = vmatprep.subr.bf16.mxu1 %v3701_v36 }
0x1bdf   :  { %3299 = vmatpush3.bf16.msra.mxu1 %v3579_v45 }
0x1c95   :  { %v2468_v35 = vpop.f32.mrb[28].mxu1 }
0x1c96   :  { %v2469_v41 = vadd.f32 %v2956_v19, %v2468_v35  ;;  %v3274_v51 = vpop.f32.mrb[29].mxu1 }
0x1c97   :  { %v2471_v54 = vpop.f32.mrb[30].mxu1 }
0x1c98   :  { %v4294_v44 = vadd.f32 %v2469_v41, %v4120_v9  ;;  %v2472_v46 = vadd.f32 %v2956_v19, %v2471_v54  ;;  %v3275_v47 = vpop.f32.mrb[31].mxu1 }
0x1c9a   :  { %v4297_v48 = vadd.f32 %v2472_v46, %v4123_v11  ;;  %v2477_v49 = vsel %vm213_vm1, %v4294_v44, 0.0  ;;  %v2986_v46 = vld [vmem:[%s4405_s11 + $0x1] ss:$0 sm:$0xff] }
0x1c9b   :  { %2478 = vadd.xlane.f32.xlu0 %v2477_v49 }
0x1c9c   :  { %v2480_v50 = vsel %vm217_vm2, %v4297_v48, 0.0 }
0x1c9d   :  { %2481 = vadd.xlane.f32.xlu1 %v2480_v50 }
0x1d28   :  { %v2479_v52 = vpop.xlane.xlu0 %2478 }
0x1d29   :  { %v2483_v53 = vmul.f32 0.03125, %v2479_v52 }
0x1d2a   :  { %v2482_v55 = vpop.xlane.xlu1 %2481 }
0x1d2b   :  { %v2485_v60 = vsub.f32 %v4294_v44, %v2483_v53  ;;  %v2484_v9 = vmul.f32 0.03125, %v2482_v55 }
0x1d2d   :  { %v2486_v38 = vsub.f32 %v4297_v48, %v2484_v9  ;;  %v2487_v39 = vmul.f32 %v2485_v60, %v2485_v60 }
0x1d2f   :  { %v2489_v11 = vsel %vm213_vm1, %v2487_v39, 0.0  ;;  %v2488_v57 = vmul.f32 %v2486_v38, %v2486_v38 }
0x1d30   :  { %2490 = vadd.xlane.f32.xlu0 %v2489_v11 }
0x1d31   :  { %v2492_v58 = vsel %vm217_vm2, %v2488_v57, 0.0 }
0x1d34   :  { %2493 = vadd.xlane.f32.xlu0 %v2492_v58 }
0x1dbd   :  { %v2491_v0 = vpop.xlane.xlu0 %2490 }
0x1dbe   :  { %v2495_v63 = vmul.f32 0.03125, %v2491_v0 }
0x1dc0   :  { %v2497_v2 = vadd.f32 1e-06, %v2495_v63 }
0x1dc1   :  { %v2494_v4 = vpop.xlane.xlu0 %2493 }
0x1dc2   :  { %v2496_v5 = vmul.f32 0.03125, %v2494_v4  ;;  %3662 = vrsqrt.f32 %v2497_v2 }
0x1dc4   :  { %v2498_v3 = vadd.f32 1e-06, %v2496_v5  ;;  %v3581_v5 = vld [vmem:[%s4408_s14 + $0x8] sm:$0xff]  }
0x1dc6   :  { %3664 = vrsqrt.f32 %v2498_v3 }
0x1dcc   :  { %v3663_v6 = vpop.eup %3662 }
0x1dcd   :  { %v2501_v8 = vmul.f32 %v3663_v6, %v2485_v60 }
0x1dd0   :  { %v3665_v7 = vpop.eup %3664 }
0x1dd1   :  { %v2502_v18 = vmul.f32 %v3665_v7, %v2486_v38 }
0x1dd3   :  { %v2503_v10 = vpack.c.bf16 %v2502_v18, %v2501_v8 }
0x1dd5   :  { %3281 = vmatmul.mubr.msk.bf16.vlgmr.msra.gmra.mrb[32].mxu0 %vm213_vm1, %v2503_v10 }
0x1dd6   :  { %3308 = vmatprep.mubr.msk.bf16.mxu0 %vm3702_vm3, %v3701_v36 }
0x1ea8   :  { %v2566_v28 = vpop.f32.mrb[32].mxu0 }
0x1ea9   :  { %v2567_v23 = vadd.f32 %v2965_v61, %v2566_v28  ;;  %v3282_v24 = vpop.f32.mrb[33].mxu0 }
0x1eaa   :  { %v2569_v1 = vpop.f32.mrb[34].mxu0 }
0x1eab   :  { %v2573_v56 = vmul.f32 %v2567_v23, %v2567_v23  ;;  %v2570_v25 = vadd.f32 %v2965_v61, %v2569_v1  ;;  %v3283_v42 = vpop.f32.mrb[35].mxu0 }
0x1ead   :  { %v2575_v43 = vmul.f32 %v2573_v56, %v2567_v23  ;;  %v2574_v26 = vmul.f32 %v2570_v25, %v2570_v25 }
0x1eaf   :  { %v2577_v27 = vmul.f32 0.044715, %v2575_v43  ;;  %v2576_v29 = vmul.f32 %v2574_v26, %v2570_v25 }
0x1eb1   :  { %v2579_v30 = vadd.f32 %v2577_v27, %v2567_v23  ;;  %v2578_v31 = vmul.f32 0.044715, %v2576_v29 }
0x1eb3   :  { %v2581_v32 = vmul.f32 0.7978846, %v2579_v30  ;;  %v2580_v33 = vadd.f32 %v2578_v31, %v2570_v25 }
0x1eb5   :  { %3666 = vtanh.f32 %v2581_v32  ;;  %v2582_v34 = vmul.f32 0.7978846, %v2580_v33 }
0x1eb7   :  { %3668 = vtanh.f32 %v2582_v34 }
0x1ebf   :  { %v3667_v16 = vpop.eup %3666 }
0x1ec0   :  { %v2585_v17 = vadd.f32 1.0, %v3667_v16 }
0x1ec1   :  { %v3669_v37 = vpop.eup %3668 }
0x1ec2   :  { %v2587_v40 = vmul.f32 0.5, %v2585_v17  ;;  %v2586_v19 = vadd.f32 1.0, %v3669_v37 }
0x1ec4   :  { %v2588_v35 = vmul.f32 0.5, %v2586_v19  ;;  %v2589_v41 = vmul.f32 %v2587_v40, %v2567_v23 }
0x1ec6   :  { %v2590_v51 = vmul.f32 %v2588_v35, %v2570_v25 }
0x1ec8   :  { %v2591_v54 = vpack.c.bf16 %v2590_v51, %v2589_v41 }
0x1eca   :  { %3301 = vmatmul.mubr.bf16.vlgmr.msra.gmra.mrb[32].mxu1 %v2591_v54 }
0x1f9d   :  { %v2699_v47 = vpop.f32.mrb[32].mxu1 }
0x1f9e   :  { %v2700_v49 = vadd.f32 %v2986_v46, %v2699_v47  ;;  %v3302_v50 = vpop.f32.mrb[33].mxu1 }
0x1f9f   :  { %v2702_v52 = vpop.f32.mrb[34].mxu1 }
0x1fa0   :  { %v2703_v53 = vadd.f32 %v2986_v46, %v2702_v52  ;;  %v3303_v55 = vpop.f32.mrb[35].mxu1  ;;  %v2706_v60 = vadd.f32 %v2700_v49, %v4294_v44 }
0x1fa2   :  { %v2708_v9 = vsel %vm213_vm1, %v2706_v60, 0.0  ;;  %v2707_v38 = vadd.f32 %v2703_v53, %v4297_v48  ;;  %v3580_v48 = vld [vmem:[%s4408_s14] sm:$0xff]   ;;  %s2838_s14 = sshll.u32 %s3718_s12, 4  ;;  %s2839_s14 = int_to_ptr.vmem [resolvable:$true] %s2838_s14 }
0x1fa3   :  { %2709 = vadd.xlane.f32.xlu0 %v2708_v9  ;;  %3305 = vmatpush3.bf16.msra.mxu0 %v3580_v48  ;;  %s3676_s13 = scalar_lea.vmem %s2839_s14, 128  ;;  %p3681_p1 = scmp.lt.s32.totalorder %s2839_s14, %s2839_s14 }
0x1fa4   :  { %v2711_v39 = vsel %vm217_vm2, %v2707_v38, 0.0  ;;  %3306 = vmatprep.subr.bf16.mxu0 %v3701_v36  ;;  %p3677_p0 = scmp.ne.s32.totalorder %s2839_s14, %s3676_s13  ;;  %p3682_p2 = scmp.lt.s32.totalorder %s3676_s13, %s3676_s13 }
0x1fa5   :  { %2712 = vadd.xlane.f32.xlu1 %v2711_v39 }
0x1fa6   :  { %p3683_p3 = por %p3682_p2, %p3681_p1 }
0x1fa7   :  { %3307 = vmatpush3.bf16.msra.mxu0 %v3581_v5 }
0x1fa8   :  { %p3684_p4 = pnand %p3683_p3, %p3677_p0 }
0x2030   :  { %v2710_v11 = vpop.xlane.xlu0 %2709 }
0x2031   :  { %v2714_v57 = vmul.f32 0.03125, %v2710_v11 }
0x2032   :  { %v2713_v58 = vpop.xlane.xlu1 %2712 }
0x2033   :  { %v2716_v59 = vsub.f32 %v2706_v60, %v2714_v57  ;;  %v2715_v62 = vmul.f32 0.03125, %v2713_v58 }
0x2035   :  { %v2717_v0 = vsub.f32 %v2707_v38, %v2715_v62  ;;  %v2718_v63 = vmul.f32 %v2716_v59, %v2716_v59 }
0x2037   :  { %v2720_v2 = vsel %vm213_vm1, %v2718_v63, 0.0  ;;  %v2719_v4 = vmul.f32 %v2717_v0, %v2717_v0 }
0x2038   :  { %2721 = vadd.xlane.f32.xlu0 %v2720_v2 }
0x2039   :  { %v2723_v44 = vsel %vm217_vm2, %v2719_v4, 0.0 }
0x203a   :  { %2724 = vadd.xlane.f32.xlu1 %v2723_v44 }
0x20c5   :  { %v2722_v3 = vpop.xlane.xlu0 %2721 }
0x20c6   :  { %v2726_v6 = vmul.f32 0.03125, %v2722_v3 }
0x20c7   :  { %v2725_v7 = vpop.xlane.xlu1 %2724 }
0x20c8   :  { %v2728_v8 = vadd.f32 1e-06, %v2726_v6  ;;  %v2727_v18 = vmul.f32 0.03125, %v2725_v7 }
0x20ca   :  { %3670 = vrsqrt.f32 %v2728_v8  ;;  %v2729_v10 = vadd.f32 1e-06, %v2727_v18 }
0x20cc   :  { %3672 = vrsqrt.f32 %v2729_v10 }
0x20d4   :  { %v3671_v21 = vpop.eup %3670 }
0x20d5   :  { %v2732_v13 = vmul.f32 %v3671_v21, %v2716_v59 }
0x20d6   :  { %v3673_v36 = vpop.eup %3672 }
0x20d7   :  { %v2741_v15 = vmul.f32 %v2995_v12, %v2732_v13  ;;  %v2733_v20 = vmul.f32 %v3673_v36, %v2717_v0 }
0x20d9   :  { %v2750_v22 = vadd.f32 %v2996_v14, %v2741_v15  ;;  %v2742_v45 = vmul.f32 %v2995_v12, %v2733_v20 }
0x20db   :  { %v2751_v61 = vadd.f32 %v2996_v14, %v2742_v45  ;;  %v2757_v28 = vrot.slane %v2750_v22, 2  ;;  %v2753_v24 = vrot.slane %v2750_v22, 1 }
0x20dd   :  { %v2758_v23 = vrot.slane %v2751_v61, 2 }
0x20df   :  { %v2759_v1 = vsel %vm2756_vm13, %v2757_v28, %v2758_v23 }
0x20e0   :  { %v2762_v56 = vsel %vm2761_vm14, %v2753_v24, %v2759_v1 }
0x20e1   :  { %v2764_v25 = vpack.c.bf16 %v2762_v56, %v2762_v56  ;;  %2763 = vst.msk [vmem:[#allocation2] sm:$0xff] %vm213_vm1, %v2762_v56 }
0x20e3   :  { %3309 = vmatmul.mubr.msk.bf16.vlgmr.msra.gmra.mrb[36].mxu0 %vm213_vm1, %v2764_v25 }
0x20e4   :  { %3687 = shalt.err (!%p3684_p4)
}
0x20e5   :  { %s3688_s1 = scalar_lea.hbm %s4410_s16, 128 }
0x20e6   :  { %p3689_p5 = scmp.ne.s32.totalorder %s4410_s16, %s3688_s1  ;;  %p3692_p6 = scmp.lt.u32.totalorder %s3688_s1, %s4410_s16 }
0x20e8   :  { %p3694_p7 = pnand %p3692_p6, %p3689_p5 }
0x20ea   :  { %3697 = shalt.err (!%p3694_p7)
}
0x20eb   :  { %2841 = dma.vmem_to_hbm [thread:$0]  %s2839_s14, 128, %s4410_s16, [#allocation3]   ;;  %v2997_v42 = vld [vmem:[%s4409_s15] ss:$0 sm:$0xff] }
0x21b6   :  { %v2825_v43 = vpop.f32.mrb[36].mxu0 }
0x21b7   :  { %v2826_v26 = vadd.f32 %v2997_v42, %v2825_v43  ;;  %v3310_v27 = vpop.f32.mrb[37].mxu0 }
0x21b8   :  { %v2828_v29 = vpop.f32.mrb[38].mxu0 }
0x21b9   :  { %2831 = vst [vmem:[%s4411_s17] sm:$0xff] %v2826_v26  ;;  %v3311_v30 = vpop.f32.mrb[39].mxu0 }
0x21ba   :  { %3698 = dma.done.wait [#allocation3], 128  }
0x21bb   :  { %3699 = vsyncadd [#allocation3], 4294967168 }
0x21bc   :  { %2849 = vsyncpa [#allocation3], 1 }

</bundles_post_ra>
